<compile_context>
chip_gen: v7x
topology: tpu7x:2x2x1
jax: 0.10.0
libtpu: 0.0.40
codegen_flags: <defaults>
</compile_context>

<pallas_src>
import jax
import jax.numpy as jnp
from jax.experimental import pallas as pl
from jax.experimental.pallas import tpu as pltpu

INPUT_SIZE = 10
HIDDEN_SIZE = 300
OUTPUT_SIZE = 2
HIDDEN_PADDED = 384            # 300 rounded up to a multiple of 128 lanes
MAX_BATCH_TILE = 1024          # max batch rows per grid step (multiple of 8 sublanes)


def _round_up(n, m):
    return (n + m - 1) // m * m


def _cdiv(n, m):
    return (n + m - 1) // m


def _choose_batch_tiling(B):
    """Balanced batch tiling; prefer an even number of >=2 tiles for v7x megacore."""
    B = max(B, 1)
    n_tiles = _cdiv(B, MAX_BATCH_TILE)
    if B > 8:
        if n_tiles == 1:
            n_tiles = 2              # give the second v7x TensorCore work
        elif n_tiles % 2 == 1:
            n_tiles += 1             # prefer even tile counts
    TB = _round_up(_cdiv(B, n_tiles), 8)
    B_pad = n_tiles * TB
    return TB, B_pad, n_tiles


def _mlp_kernel(x_ref,
                w1, b1, w2, b2, w3, b3, w4, b4, w5, b5, w6, b6, w7, b7,
                o_ref):
    """One batch tile through all 7 layers; weights stay resident in VMEM.

    Weights are bf16, matmuls accumulate in f32 (preferred_element_type), and the
    bias-add / ReLU / log-softmax run in f32.
    """
    h = x_ref[...].astype(jnp.bfloat16)   # (TB, INPUT_SIZE) bf16 for the MXU

    def linear_relu(h_bf16, w_ref, b_ref):
        y = jnp.dot(h_bf16, w_ref[...],
                    preferred_element_type=jnp.float32) + b_ref[...]
        return jnp.maximum(y, 0.0).astype(jnp.bfloat16)

    h = linear_relu(h, w1, b1)
    h = linear_relu(h, w2, b2)
    h = linear_relu(h, w3, b3)
    h = linear_relu(h, w4, b4)
    h = linear_relu(h, w5, b5)
    h = linear_relu(h, w6, b6)

    # final layer (no ReLU); output is the logical 2-wide logit axis, f32
    logits = jnp.dot(h, w7[...], preferred_element_type=jnp.float32) + b7[...]

    # LogSoftmax over dim=1, numerically stable, in f32.
    m = jnp.max(logits, axis=1, keepdims=True)
    shifted = logits - m
    lse = jnp.log(jnp.sum(jnp.exp(shifted), axis=1, keepdims=True))
    o_ref[...] = (shifted - lse).astype(o_ref.dtype)


def pad_params(params):
    """Zero-pad the hidden dimension 300 -> 384 and cast weights to bf16.

    Padded bias columns are zero, so padded activation columns are
    ReLU(0 + 0) = 0 and contribute nothing to the next layer's matmul.
    Biases stay f32 (bias-add happens in f32 inside the kernel).
    """
    padded = []
    n = len(params)
    for i, (w, b) in enumerate(params):
        fan_in, fan_out = w.shape
        pad_in = (HIDDEN_PADDED - fan_in) if i > 0 else 0
        pad_out = (HIDDEN_PADDED - fan_out) if i < n - 1 else 0
        w_p = jnp.pad(w, ((0, pad_in), (0, pad_out))).astype(jnp.bfloat16)
        b_p = jnp.pad(b, ((0, 0), (0, pad_out))).astype(jnp.float32)
        padded.append((w_p, b_p))
    return padded


@jax.jit
def mlp_forward(x, padded_params):
    """x: (B, INPUT_SIZE) f32.  padded_params: list of (W_t bf16, b f32) from pad_params."""
    B = x.shape[0]
    TB, B_pad, n_tiles = _choose_batch_tiling(B)
    if B_pad != B:
        x = jnp.pad(x, ((0, B_pad - B), (0, 0)))
    grid = (n_tiles,)

    def const_spec(shape):
        nd = len(shape)
        return pl.BlockSpec(shape, lambda i: (0,) * nd)

    flat_args = [x]
    in_specs = [pl.BlockSpec((TB, INPUT_SIZE), lambda i: (i, 0))]
    for (w, b) in padded_params:
        flat_args += [w, b]
        in_specs += [const_spec(w.shape), const_spec(b.shape)]

    out = pl.pallas_call(
        _mlp_kernel,
        out_shape=jax.ShapeDtypeStruct((B_pad, OUTPUT_SIZE), jnp.float32),
        grid=grid,
        in_specs=in_specs,
        out_specs=pl.BlockSpec((TB, OUTPUT_SIZE), lambda i: (i, 0)),
        compiler_params=pltpu.CompilerParams(
            dimension_semantics=("parallel",),
            vmem_limit_bytes=32 << 20,
        ),
    )(*flat_args)
    return out[:B]


def init_params(key):
    """Deterministic init mimicking PyTorch Linear default (uniform +-1/sqrt(fan_in)).

    Returns list of (W_t, b) with W_t shape (in, out) and b shape (1, out), f32."""
    sizes = [(INPUT_SIZE, HIDDEN_SIZE)] + \
            [(HIDDEN_SIZE, HIDDEN_SIZE)] * 5 + \
            [(HIDDEN_SIZE, OUTPUT_SIZE)]
    params = []
    for (fan_in, fan_out) in sizes:
        key, kw, kb = jax.random.split(key, 3)
        bound = 1.0 / (fan_in ** 0.5)
        w = jax.random.uniform(kw, (fan_in, fan_out), jnp.float32, -bound, bound)
        b = jax.random.uniform(kb, (1, fan_out), jnp.float32, -bound, bound)
        params.append((w, b))
    return params


def reference_forward(x, params):
    """Full-precision f32 reference (PyTorch-equivalent forward)."""
    h = x
    for i, (w, b) in enumerate(params):
        h = h @ w + b
        if i < len(params) - 1:
            h = jnp.maximum(h, 0.0)
    return jax.nn.log_softmax(h, axis=1)


if __name__ == "__main__":
    key = jax.random.PRNGKey(0)
    key, kx1, kx2 = jax.random.split(key, 3)

    params = init_params(key)
    padded_params = pad_params(params)

    # Small single-tile batch and a multi-tile, padded batch.
    for batch, kx in ((8, kx1), (37, kx2)):
        x = jax.random.normal(kx, (batch, INPUT_SIZE), jnp.float32)

        out = mlp_forward(x, padded_params)
        out = jax.block_until_ready(out)

        ref = reference_forward(x, params)
        assert out.shape == (batch, OUTPUT_SIZE), out.shape
        # bf16 matmuls (f32 accumulation) => loosened tolerance vs the f32 reference.
        max_err = float(jnp.max(jnp.abs(out - ref)))
        assert max_err < 5e-2, f"max abs err = {max_err}"

    print("KERNEL_OK")
</pallas_src>

<mosaic_0001>
module attributes {stable_mosaic.version = 11 : i64} {
  func.func @_mlp_kernel(%arg0: i32, %arg1: memref<8x10xf32, #tpu.memory_space<vmem>>, %arg2: memref<10x384xbf16, #tpu.memory_space<vmem>>, %arg3: memref<1x384xf32, #tpu.memory_space<vmem>>, %arg4: memref<384x384xbf16, #tpu.memory_space<vmem>>, %arg5: memref<1x384xf32, #tpu.memory_space<vmem>>, %arg6: memref<384x384xbf16, #tpu.memory_space<vmem>>, %arg7: memref<1x384xf32, #tpu.memory_space<vmem>>, %arg8: memref<384x384xbf16, #tpu.memory_space<vmem>>, %arg9: memref<1x384xf32, #tpu.memory_space<vmem>>, %arg10: memref<384x384xbf16, #tpu.memory_space<vmem>>, %arg11: memref<1x384xf32, #tpu.memory_space<vmem>>, %arg12: memref<384x384xbf16, #tpu.memory_space<vmem>>, %arg13: memref<1x384xf32, #tpu.memory_space<vmem>>, %arg14: memref<384x2xbf16, #tpu.memory_space<vmem>>, %arg15: memref<1x2xf32, #tpu.memory_space<vmem>>, %arg16: memref<8x2xf32, #tpu.memory_space<vmem>>) attributes {dimension_semantics = [#tpu.dimension_semantics<parallel>], iteration_bounds = array<i64: 1>, scalar_prefetch = 0 : i64, scratch_operands = 0 : i64, tpu.core_type = #tpu.core_type<tc>, window_params = [{transform_indices = @transform_0, window_bounds = array<i64: 8, 10>}, {pipeline_mode = #tpu.pipeline_mode<synchronous>, transform_indices = @transform_1, window_bounds = array<i64: 10, 384>}, {pipeline_mode = #tpu.pipeline_mode<synchronous>, transform_indices = @transform_2, window_bounds = array<i64: 1, 384>}, {pipeline_mode = #tpu.pipeline_mode<synchronous>, transform_indices = @transform_3, window_bounds = array<i64: 384, 384>}, {pipeline_mode = #tpu.pipeline_mode<synchronous>, transform_indices = @transform_4, window_bounds = array<i64: 1, 384>}, {pipeline_mode = #tpu.pipeline_mode<synchronous>, transform_indices = @transform_5, window_bounds = array<i64: 384, 384>}, {pipeline_mode = #tpu.pipeline_mode<synchronous>, transform_indices = @transform_6, window_bounds = array<i64: 1, 384>}, {pipeline_mode = #tpu.pipeline_mode<synchronous>, transform_indices = @transform_7, window_bounds = array<i64: 384, 384>}, {pipeline_mode = #tpu.pipeline_mode<synchronous>, transform_indices = @transform_8, window_bounds = array<i64: 1, 384>}, {pipeline_mode = #tpu.pipeline_mode<synchronous>, transform_indices = @transform_9, window_bounds = array<i64: 384, 384>}, {pipeline_mode = #tpu.pipeline_mode<synchronous>, transform_indices = @transform_10, window_bounds = array<i64: 1, 384>}, {pipeline_mode = #tpu.pipeline_mode<synchronous>, transform_indices = @transform_11, window_bounds = array<i64: 384, 384>}, {pipeline_mode = #tpu.pipeline_mode<synchronous>, transform_indices = @transform_12, window_bounds = array<i64: 1, 384>}, {pipeline_mode = #tpu.pipeline_mode<synchronous>, transform_indices = @transform_13, window_bounds = array<i64: 384, 2>}, {pipeline_mode = #tpu.pipeline_mode<synchronous>, transform_indices = @transform_14, window_bounds = array<i64: 1, 2>}, {transform_indices = @transform_15, window_bounds = array<i64: 8, 2>}]} {
    %c0 = arith.constant 0 : index
    %c0_0 = arith.constant 0 : index
    %0 = vector.load %arg1[%c0, %c0_0] : memref<8x10xf32, #tpu.memory_space<vmem>>, vector<8x10xf32>
    %1 = arith.truncf %0 : vector<8x10xf32> to vector<8x10xbf16>
    %c0_1 = arith.constant 0 : index
    %c0_2 = arith.constant 0 : index
    %2 = vector.load %arg2[%c0_1, %c0_2] : memref<10x384xbf16, #tpu.memory_space<vmem>>, vector<10x384xbf16>
    %cst = arith.constant dense<0.000000e+00> : vector<8x384xf32>
    %3 = tpu.matmul %1, %2, %cst {dimension_numbers = #tpu.dot_dimension_numbers<[1], [0], [0], [1], [0, 0, 1, 1], [], []>} : vector<8x10xbf16>, vector<10x384xbf16>, vector<8x384xf32> -> vector<8x384xf32>
    %c0_3 = arith.constant 0 : index
    %c0_4 = arith.constant 0 : index
    %4 = vector.load %arg3[%c0_3, %c0_4] : memref<1x384xf32, #tpu.memory_space<vmem>>, vector<1x384xf32>
    %5 = vector.broadcast %4 : vector<1x384xf32> to vector<8x384xf32>
    %6 = arith.addf %3, %5 : vector<8x384xf32>
    %cst_5 = arith.constant 0.000000e+00 : f32
    %7 = vector.broadcast %cst_5 : f32 to vector<8x384xf32>
    %8 = arith.maximumf %6, %7 : vector<8x384xf32>
    %9 = arith.truncf %8 : vector<8x384xf32> to vector<8x384xbf16>
    %c0_6 = arith.constant 0 : index
    %c0_7 = arith.constant 0 : index
    %10 = vector.load %arg4[%c0_6, %c0_7] : memref<384x384xbf16, #tpu.memory_space<vmem>>, vector<384x384xbf16>
    %cst_8 = arith.constant dense<0.000000e+00> : vector<8x384xf32>
    %11 = tpu.matmul %9, %10, %cst_8 {dimension_numbers = #tpu.dot_dimension_numbers<[1], [0], [0], [1], [0, 0, 1, 1], [], []>} : vector<8x384xbf16>, vector<384x384xbf16>, vector<8x384xf32> -> vector<8x384xf32>
    %c0_9 = arith.constant 0 : index
    %c0_10 = arith.constant 0 : index
    %12 = vector.load %arg5[%c0_9, %c0_10] : memref<1x384xf32, #tpu.memory_space<vmem>>, vector<1x384xf32>
    %13 = vector.broadcast %12 : vector<1x384xf32> to vector<8x384xf32>
    %14 = arith.addf %11, %13 : vector<8x384xf32>
    %cst_11 = arith.constant 0.000000e+00 : f32
    %15 = vector.broadcast %cst_11 : f32 to vector<8x384xf32>
    %16 = arith.maximumf %14, %15 : vector<8x384xf32>
    %17 = arith.truncf %16 : vector<8x384xf32> to vector<8x384xbf16>
    %c0_12 = arith.constant 0 : index
    %c0_13 = arith.constant 0 : index
    %18 = vector.load %arg6[%c0_12, %c0_13] : memref<384x384xbf16, #tpu.memory_space<vmem>>, vector<384x384xbf16>
    %cst_14 = arith.constant dense<0.000000e+00> : vector<8x384xf32>
    %19 = tpu.matmul %17, %18, %cst_14 {dimension_numbers = #tpu.dot_dimension_numbers<[1], [0], [0], [1], [0, 0, 1, 1], [], []>} : vector<8x384xbf16>, vector<384x384xbf16>, vector<8x384xf32> -> vector<8x384xf32>
    %c0_15 = arith.constant 0 : index
    %c0_16 = arith.constant 0 : index
    %20 = vector.load %arg7[%c0_15, %c0_16] : memref<1x384xf32, #tpu.memory_space<vmem>>, vector<1x384xf32>
    %21 = vector.broadcast %20 : vector<1x384xf32> to vector<8x384xf32>
    %22 = arith.addf %19, %21 : vector<8x384xf32>
    %cst_17 = arith.constant 0.000000e+00 : f32
    %23 = vector.broadcast %cst_17 : f32 to vector<8x384xf32>
    %24 = arith.maximumf %22, %23 : vector<8x384xf32>
    %25 = arith.truncf %24 : vector<8x384xf32> to vector<8x384xbf16>
    %c0_18 = arith.constant 0 : index
    %c0_19 = arith.constant 0 : index
    %26 = vector.load %arg8[%c0_18, %c0_19] : memref<384x384xbf16, #tpu.memory_space<vmem>>, vector<384x384xbf16>
    %cst_20 = arith.constant dense<0.000000e+00> : vector<8x384xf32>
    %27 = tpu.matmul %25, %26, %cst_20 {dimension_numbers = #tpu.dot_dimension_numbers<[1], [0], [0], [1], [0, 0, 1, 1], [], []>} : vector<8x384xbf16>, vector<384x384xbf16>, vector<8x384xf32> -> vector<8x384xf32>
    %c0_21 = arith.constant 0 : index
    %c0_22 = arith.constant 0 : index
    %28 = vector.load %arg9[%c0_21, %c0_22] : memref<1x384xf32, #tpu.memory_space<vmem>>, vector<1x384xf32>
    %29 = vector.broadcast %28 : vector<1x384xf32> to vector<8x384xf32>
    %30 = arith.addf %27, %29 : vector<8x384xf32>
    %cst_23 = arith.constant 0.000000e+00 : f32
    %31 = vector.broadcast %cst_23 : f32 to vector<8x384xf32>
    %32 = arith.maximumf %30, %31 : vector<8x384xf32>
    %33 = arith.truncf %32 : vector<8x384xf32> to vector<8x384xbf16>
    %c0_24 = arith.constant 0 : index
    %c0_25 = arith.constant 0 : index
    %34 = vector.load %arg10[%c0_24, %c0_25] : memref<384x384xbf16, #tpu.memory_space<vmem>>, vector<384x384xbf16>
    %cst_26 = arith.constant dense<0.000000e+00> : vector<8x384xf32>
    %35 = tpu.matmul %33, %34, %cst_26 {dimension_numbers = #tpu.dot_dimension_numbers<[1], [0], [0], [1], [0, 0, 1, 1], [], []>} : vector<8x384xbf16>, vector<384x384xbf16>, vector<8x384xf32> -> vector<8x384xf32>
    %c0_27 = arith.constant 0 : index
    %c0_28 = arith.constant 0 : index
    %36 = vector.load %arg11[%c0_27, %c0_28] : memref<1x384xf32, #tpu.memory_space<vmem>>, vector<1x384xf32>
    %37 = vector.broadcast %36 : vector<1x384xf32> to vector<8x384xf32>
    %38 = arith.addf %35, %37 : vector<8x384xf32>
    %cst_29 = arith.constant 0.000000e+00 : f32
    %39 = vector.broadcast %cst_29 : f32 to vector<8x384xf32>
    %40 = arith.maximumf %38, %39 : vector<8x384xf32>
    %41 = arith.truncf %40 : vector<8x384xf32> to vector<8x384xbf16>
    %c0_30 = arith.constant 0 : index
    %c0_31 = arith.constant 0 : index
    %42 = vector.load %arg12[%c0_30, %c0_31] : memref<384x384xbf16, #tpu.memory_space<vmem>>, vector<384x384xbf16>
    %cst_32 = arith.constant dense<0.000000e+00> : vector<8x384xf32>
    %43 = tpu.matmul %41, %42, %cst_32 {dimension_numbers = #tpu.dot_dimension_numbers<[1], [0], [0], [1], [0, 0, 1, 1], [], []>} : vector<8x384xbf16>, vector<384x384xbf16>, vector<8x384xf32> -> vector<8x384xf32>
    %c0_33 = arith.constant 0 : index
    %c0_34 = arith.constant 0 : index
    %44 = vector.load %arg13[%c0_33, %c0_34] : memref<1x384xf32, #tpu.memory_space<vmem>>, vector<1x384xf32>
    %45 = vector.broadcast %44 : vector<1x384xf32> to vector<8x384xf32>
    %46 = arith.addf %43, %45 : vector<8x384xf32>
    %cst_35 = arith.constant 0.000000e+00 : f32
    %47 = vector.broadcast %cst_35 : f32 to vector<8x384xf32>
    %48 = arith.maximumf %46, %47 : vector<8x384xf32>
    %49 = arith.truncf %48 : vector<8x384xf32> to vector<8x384xbf16>
    %c0_36 = arith.constant 0 : index
    %c0_37 = arith.constant 0 : index
    %50 = vector.load %arg14[%c0_36, %c0_37] : memref<384x2xbf16, #tpu.memory_space<vmem>>, vector<384x2xbf16>
    %cst_38 = arith.constant dense<0.000000e+00> : vector<8x2xf32>
    %51 = tpu.matmul %49, %50, %cst_38 {dimension_numbers = #tpu.dot_dimension_numbers<[1], [0], [0], [1], [0, 0, 1, 1], [], []>} : vector<8x384xbf16>, vector<384x2xbf16>, vector<8x2xf32> -> vector<8x2xf32>
    %c0_39 = arith.constant 0 : index
    %c0_40 = arith.constant 0 : index
    %52 = vector.load %arg15[%c0_39, %c0_40] : memref<1x2xf32, #tpu.memory_space<vmem>>, vector<1x2xf32>
    %53 = vector.broadcast %52 : vector<1x2xf32> to vector<8x2xf32>
    %54 = arith.addf %51, %53 : vector<8x2xf32>
    %cst_41 = arith.constant dense<0xFF800000> : vector<8xf32>
    %55 = vector.multi_reduction <maximumf>, %54, %cst_41 [1] : vector<8x2xf32> to vector<8xf32>
    %56 = vector.shape_cast %55 : vector<8xf32> to vector<8x1xf32>
    %57 = vector.broadcast %56 : vector<8x1xf32> to vector<8x2xf32>
    %58 = arith.subf %54, %57 : vector<8x2xf32>
    %59 = math.exp %58 : vector<8x2xf32>
    %cst_42 = arith.constant dense<0.000000e+00> : vector<8xf32>
    %60 = vector.multi_reduction <add>, %59, %cst_42 [1] : vector<8x2xf32> to vector<8xf32>
    %61 = vector.shape_cast %60 : vector<8xf32> to vector<8x1xf32>
    %62 = math.log %61 : vector<8x1xf32>
    %63 = vector.broadcast %62 : vector<8x1xf32> to vector<8x2xf32>
    %64 = arith.subf %58, %63 : vector<8x2xf32>
    %c0_43 = arith.constant 0 : index
    %c0_44 = arith.constant 0 : index
    %65 = vector.load %arg16[%c0_43, %c0_44] : memref<8x2xf32, #tpu.memory_space<vmem>>, vector<8x2xf32>
    tpu.vector_store %arg16[%c0_43, %c0_44], %64 {strides = array<i32>} : memref<8x2xf32, #tpu.memory_space<vmem>>, vector<8x2xf32>,
    return
  }
  func.func @transform_0(%arg0: i32) -> (i32, i32) {
    %c0_i32 = arith.constant 0 : i32
    %c0_i32_0 = arith.constant 0 : i32
    return %arg0, %c0_i32 : i32, i32
  }
  func.func @transform_1(%arg0: i32) -> (i32, i32) {
    %c0_i32 = arith.constant 0 : i32
    %c0_i32_0 = arith.constant 0 : i32
    %c0_i32_1 = arith.constant 0 : i32
    return %c0_i32, %c0_i32_0 : i32, i32
  }
  func.func @transform_2(%arg0: i32) -> (i32, i32) {
    %c0_i32 = arith.constant 0 : i32
    %c0_i32_0 = arith.constant 0 : i32
    %c0_i32_1 = arith.constant 0 : i32
    return %c0_i32, %c0_i32_0 : i32, i32
  }
  func.func @transform_3(%arg0: i32) -> (i32, i32) {
    %c0_i32 = arith.constant 0 : i32
    %c0_i32_0 = arith.constant 0 : i32
    %c0_i32_1 = arith.constant 0 : i32
    return %c0_i32, %c0_i32_0 : i32, i32
  }
  func.func @transform_4(%arg0: i32) -> (i32, i32) {
    %c0_i32 = arith.constant 0 : i32
    %c0_i32_0 = arith.constant 0 : i32
    %c0_i32_1 = arith.constant 0 : i32
    return %c0_i32, %c0_i32_0 : i32, i32
  }
  func.func @transform_5(%arg0: i32) -> (i32, i32) {
    %c0_i32 = arith.constant 0 : i32
    %c0_i32_0 = arith.constant 0 : i32
    %c0_i32_1 = arith.constant 0 : i32
    return %c0_i32, %c0_i32_0 : i32, i32
  }
  func.func @transform_6(%arg0: i32) -> (i32, i32) {
    %c0_i32 = arith.constant 0 : i32
    %c0_i32_0 = arith.constant 0 : i32
    %c0_i32_1 = arith.constant 0 : i32
    return %c0_i32, %c0_i32_0 : i32, i32
  }
  func.func @transform_7(%arg0: i32) -> (i32, i32) {
    %c0_i32 = arith.constant 0 : i32
    %c0_i32_0 = arith.constant 0 : i32
    %c0_i32_1 = arith.constant 0 : i32
    return %c0_i32, %c0_i32_0 : i32, i32
  }
  func.func @transform_8(%arg0: i32) -> (i32, i32) {
    %c0_i32 = arith.constant 0 : i32
    %c0_i32_0 = arith.constant 0 : i32
    %c0_i32_1 = arith.constant 0 : i32
    return %c0_i32, %c0_i32_0 : i32, i32
  }
  func.func @transform_9(%arg0: i32) -> (i32, i32) {
    %c0_i32 = arith.constant 0 : i32
    %c0_i32_0 = arith.constant 0 : i32
    %c0_i32_1 = arith.constant 0 : i32
    return %c0_i32, %c0_i32_0 : i32, i32
  }
  func.func @transform_10(%arg0: i32) -> (i32, i32) {
    %c0_i32 = arith.constant 0 : i32
    %c0_i32_0 = arith.constant 0 : i32
    %c0_i32_1 = arith.constant 0 : i32
    return %c0_i32, %c0_i32_0 : i32, i32
  }
  func.func @transform_11(%arg0: i32) -> (i32, i32) {
    %c0_i32 = arith.constant 0 : i32
    %c0_i32_0 = arith.constant 0 : i32
    %c0_i32_1 = arith.constant 0 : i32
    return %c0_i32, %c0_i32_0 : i32, i32
  }
  func.func @transform_12(%arg0: i32) -> (i32, i32) {
    %c0_i32 = arith.constant 0 : i32
    %c0_i32_0 = arith.constant 0 : i32
    %c0_i32_1 = arith.constant 0 : i32
    return %c0_i32, %c0_i32_0 : i32, i32
  }
  func.func @transform_13(%arg0: i32) -> (i32, i32) {
    %c0_i32 = arith.constant 0 : i32
    %c0_i32_0 = arith.constant 0 : i32
    %c0_i32_1 = arith.constant 0 : i32
    return %c0_i32, %c0_i32_0 : i32, i32
  }
  func.func @transform_14(%arg0: i32) -> (i32, i32) {
    %c0_i32 = arith.constant 0 : i32
    %c0_i32_0 = arith.constant 0 : i32
    %c0_i32_1 = arith.constant 0 : i32
    return %c0_i32, %c0_i32_0 : i32, i32
  }
  func.func @transform_15(%arg0: i32) -> (i32, i32) {
    %c0_i32 = arith.constant 0 : i32
    %c0_i32_0 = arith.constant 0 : i32
    return %arg0, %c0_i32 : i32, i32
  }
}

</mosaic_0001>

<bundles_post_ra>
// kernel: mlp_forward.1
= control target key start
LH: loop header
LB: loop body
LE: loop exit
PB: predicated region body
PF: predicated region fallthrough
CT: control target
= control target key end

     0   :  { %20 = vsyncpa [#allocation3], 0  ;;  %s5656_s0 = inlined_call_operand.vmem [shape: f32[8,10], index: 0, kind: input, shape index: {}]   ;;  %s5657_s1 = inlined_call_operand.vmem [shape: bf16[10,384], index: 1, kind: input, shape index: {}]   ;;  %s5658_s2 = inlined_call_operand.vmem [shape: f32[1,384], index: 2, kind: input, shape index: {}]   ;;  %s5659_s3 = inlined_call_operand.hbm [shape: bf16[384,384], index: 3, kind: input, shape index: {}]   ;;  %s5660_s4 = inlined_call_operand.vmem [shape: f32[1,384], index: 4, kind: input, shape index: {}]   ;;  %s5661_s5 = inlined_call_operand.hbm [shape: bf16[384,384], index: 5, kind: input, shape index: {}]   ;;  %s5662_s6 = inlined_call_operand.vmem [shape: f32[1,384], index: 6, kind: input, shape index: {}]   ;;  %s5663_s7 = inlined_call_operand.hbm [shape: bf16[384,384], index: 7, kind: input, shape index: {}]   ;;  %s5664_s8 = inlined_call_operand.vmem [shape: f32[1,384], index: 8, kind: input, shape index: {}]   ;;  %s5665_s9 = inlined_call_operand.hbm [shape: bf16[384,384], index: 9, kind: input, shape index: {}]   ;;  %s5666_s10 = inlined_call_operand.vmem [shape: f32[1,384], index: 10, kind: input, shape index: {}]   ;;  %s5667_s11 = inlined_call_operand.hbm [shape: bf16[384,384], index: 11, kind: input, shape index: {}]   ;;  %s5668_s12 = inlined_call_operand.vmem [shape: f32[1,384], index: 12, kind: input, shape index: {}]   ;;  %s5669_s13 = inlined_call_operand.vmem [shape: bf16[384,2], index: 13, kind: input, shape index: {}]   ;;  %s5670_s14 = inlined_call_operand.vmem [shape: f32[1,2], index: 14, kind: input, shape index: {}]   ;;  %s5671_s15 = inlined_call_operand.vmem [shape: f32[8,2], index: 15, kind: output, shape index: {}]  }
   0x1   :  { %21 = vsyncpa [#allocation5], 0 }
   0x2   :  { %22 = vsyncpa [#allocation8], 0  ;;  %s5254_s18 = smov [#allocation4]   ;;  %s5255_s20 = smov [#allocation7]  }
   0x3   :  { %s48_s19 = sshll.u32 %s5254_s18, 4  ;;  %s76_s21 = sshll.u32 %s5255_s20, 4  ;;  %s49_s19 = int_to_ptr.vmem [resolvable:$true] %s48_s19  ;;  %s5344_s21 = int_to_ptr.vmem [resolvable:$true] %s76_s21 }
   0x4   :  { %s5138_s24 = scalar_lea.hbm %s5661_s5, 9216 }
   0x5   :  { %p5139_p0 = scmp.ne.s32.totalorder %s5661_s5, %s5138_s24  ;;  %p5142_p1 = scmp.lt.u32.totalorder %s5138_s24, %s5661_s5 }
   0x7   :  { %p5144_p2 = pnand %p5142_p1, %p5139_p0 }
   0x9   :  { %5147 = shalt.err (!%p5144_p2)
}
   0xa   :  { %s5148_s29 = scalar_lea.vmem %s49_s19, 9216  ;;  %p5153_p4 = scmp.lt.s32.totalorder %s49_s19, %s49_s19 }
   0xb   :  { %p5149_p3 = scmp.ne.s32.totalorder %s49_s19, %s5148_s29  ;;  %p5154_p5 = scmp.lt.s32.totalorder %s5148_s29, %s5148_s29 }
   0xd   :  { %p5155_p6 = por %p5154_p5, %p5153_p4 }
   0xf   :  { %p5156_p7 = pnand %p5155_p6, %p5149_p3 }
  0x11   :  { %5159 = shalt.err (!%p5156_p7)
}
  0x12   :  { %s5256_s30 = smov 192   ;;  %s5257_s16 = smov 12  }
  0x13   :  { %54 = dma.hbm_to_vmem [thread:$0]  %s5661_s5, 9216, %s49_s19, [#allocation5], %s5256_s30, %s5256_s30, %s5257_s16  }
  0x14   :  { %s5160_s23 = scalar_lea.hbm %s5665_s9, 9216 }
  0x15   :  { %p5161_p8 = scmp.ne.s32.totalorder %s5665_s9, %s5160_s23  ;;  %p5164_p9 = scmp.lt.u32.totalorder %s5160_s23, %s5665_s9 }
  0x17   :  { %p5166_p10 = pnand %p5164_p9, %p5161_p8 }
  0x19   :  { %5169 = shalt.err (!%p5166_p10)
}
  0x1a   :  { %s5170_s28 = scalar_lea.vmem %s5344_s21, 9216  ;;  %p5175_p12 = scmp.lt.s32.totalorder %s5344_s21, %s5344_s21 }
  0x1b   :  { %p5171_p11 = scmp.ne.s32.totalorder %s5344_s21, %s5170_s28  ;;  %p5176_p13 = scmp.lt.s32.totalorder %s5170_s28, %s5170_s28 }
  0x1d   :  { %p5177_p0 = por %p5176_p13, %p5175_p12 }
  0x1f   :  { %p5178_p1 = pnand %p5177_p0, %p5171_p11 }
  0x21   :  { %5181 = shalt.err (!%p5178_p1)
}
  0x22   :  { %82 = dma.hbm_to_vmem [thread:$0]  %s5665_s9, 9216, %s5344_s21, [#allocation8], %s5256_s30, %s5256_s30, %s5257_s16  }
  0x23   :  { %s5258_s29 = smov [#allocation2]   ;;  %s5259_s18 = smov [#allocation6]  }
  0x24   :  { %s34_s17 = sshll.u32 %s5258_s29, 4  ;;  %s62_s20 = sshll.u32 %s5259_s18, 4  ;;  %s35_s17 = int_to_ptr.vmem [resolvable:$true] %s34_s17  ;;  %s5381_s20 = int_to_ptr.vmem [resolvable:$true] %s62_s20 }
  0x25   :  { %s5182_s24 = scalar_lea.hbm %s5659_s3, 9216 }
  0x26   :  { %p5183_p2 = scmp.ne.s32.totalorder %s5659_s3, %s5182_s24  ;;  %p5186_p3 = scmp.lt.u32.totalorder %s5182_s24, %s5659_s3 }
  0x28   :  { %p5188_p4 = pnand %p5186_p3, %p5183_p2 }
  0x2a   :  { %5191 = shalt.err (!%p5188_p4)
}
  0x2b   :  { %s5192_s9 = scalar_lea.vmem %s35_s17, 9216  ;;  %p5197_p6 = scmp.lt.s32.totalorder %s35_s17, %s35_s17 }
  0x2c   :  { %p5193_p5 = scmp.ne.s32.totalorder %s35_s17, %s5192_s9  ;;  %p5198_p7 = scmp.lt.s32.totalorder %s5192_s9, %s5192_s9 }
  0x2e   :  { %p5199_p8 = por %p5198_p7, %p5197_p6 }
  0x30   :  { %p5200_p9 = pnand %p5199_p8, %p5193_p5 }
  0x32   :  { %5203 = shalt.err (!%p5200_p9)
}
  0x33   :  { %40 = dma.hbm_to_vmem [thread:$0]  %s5659_s3, 9216, %s35_s17, [#allocation3], %s5256_s30, %s5256_s30, %s5257_s16  }
  0x34   :  { %s5204_s18 = scalar_lea.hbm %s5663_s7, 9216 }
  0x35   :  { %p5205_p10 = scmp.ne.s32.totalorder %s5663_s7, %s5204_s18  ;;  %p5208_p11 = scmp.lt.u32.totalorder %s5204_s18, %s5663_s7 }
  0x37   :  { %p5210_p12 = pnand %p5208_p11, %p5205_p10 }
  0x39   :  { %5213 = shalt.err (!%p5210_p12)
}
  0x3a   :  { %s5214_s26 = scalar_lea.vmem %s5381_s20, 9216  ;;  %p5219_p0 = scmp.lt.s32.totalorder %s5381_s20, %s5381_s20 }
  0x3b   :  { %p5215_p13 = scmp.ne.s32.totalorder %s5381_s20, %s5214_s26  ;;  %p5220_p1 = scmp.lt.s32.totalorder %s5214_s26, %s5214_s26 }
  0x3d   :  { %p5221_p2 = por %p5220_p1, %p5219_p0 }
  0x3f   :  { %p5222_p3 = pnand %p5221_p2, %p5215_p13 }
  0x41   :  { %5225 = shalt.err (!%p5222_p3)
}
  0x42   :  { %68 = dma.hbm_to_vmem [thread:$0]  %s5663_s7, 9216, %s5381_s20, [#allocation5], %s5256_s30, %s5256_s30, %s5257_s16  }
  0x43   :  { %s5260_s27 = smov [#allocation9]   ;;  %s5226_s5 = scalar_lea.hbm %s5667_s11, 9216 }
  0x44   :  { %s90_s28 = sshll.u32 %s5260_s27, 4  ;;  %p5227_p4 = scmp.ne.s32.totalorder %s5667_s11, %s5226_s5  ;;  %s91_s28 = int_to_ptr.vmem [resolvable:$true] %s90_s28 }
  0x45   :  { %p5230_p5 = scmp.lt.u32.totalorder %s5226_s5, %s5667_s11 }
  0x47   :  { %p5232_p6 = pnand %p5230_p5, %p5227_p4 }
  0x49   :  { %5235 = shalt.err (!%p5232_p6)
}
  0x4a   :  { %s5236_s23 = scalar_lea.vmem %s91_s28, 9216  ;;  %p5241_p8 = scmp.lt.s32.totalorder %s91_s28, %s91_s28 }
  0x4b   :  { %p5237_p7 = scmp.ne.s32.totalorder %s91_s28, %s5236_s23  ;;  %p5242_p9 = scmp.lt.s32.totalorder %s5236_s23, %s5236_s23 }
  0x4d   :  { %p5243_p10 = por %p5242_p9, %p5241_p8 }
  0x4f   :  { %p5244_p11 = pnand %p5243_p10, %p5237_p7 }
  0x51   :  { %5247 = shalt.err (!%p5244_p11)
}
  0x52   :  { %96 = dma.hbm_to_vmem [thread:$0]  %s5667_s11, 9216, %s91_s28, [#allocation8], %s5256_s30, %s5256_s30, %s5257_s16  }
  0x53   :  { %5248 = dma.done.wait [#allocation3], 9216  }
  0x54   :  { %5249 = vsyncadd [#allocation3], 4294958080 }
  0x55   :  { %5250 = dma.done.wait [#allocation5], 18432  }
  0x56   :  { %5251 = vsyncadd [#allocation5], 4294948864 }
  0x57   :  { %5252 = dma.done.wait [#allocation8], 18432  }
  0x58   :  { %5253 = vsyncadd [#allocation8], 4294948864  ;;  %v5261_v0 = vmov 0   ;;  %vm159_vm0 = vcmask 1044480   ;;  %v119_v3 = vld [vmem:[%s5656_s0] sm:$0xff]  ;;  %vm155_vm1 = vcmask 80896   ;;  %v127_v58 = vlaneseq }
  0x59   :  { %201 = vmatprep.mubr.bf16.mxu1 %v5261_v0  ;;  %v4626_v1 = vld [vmem:[%s5657_s1 + $0x4] ss:$12 sps:$4 sm:$0x1f]   ;;  %v4628_v2 = vld [vmem:[%s5657_s1] ss:$12 sps:$4 sm:$0x1f]   ;;  %v120_v6 = vpack.c.bf16 %v119_v3, %v119_v3 }
  0x5a   :  { %3884 = vmatprep.subr.msk.bf16.mxu1 %vm159_vm0, %v4626_v1  ;;  %v4629_v4 = vld [vmem:[%s5657_s1 + $0x8] ss:$12 sps:$4 sm:$0x1f]   ;;  %v161_v5 = vsel %vm159_vm0, %v4628_v2, 0  ;;  %v4630_v7 = vld [vmem:[#allocation2 + $0x4] ss:$12 sps:$4 sm:$0xff]  }
  0x5b   :  { %v4632_v8 = vld [vmem:[#allocation2] ss:$12 sps:$4 sm:$0xff]   ;;  %170 = vmatpush1.bf16.msra.mxu1 %v161_v5  ;;  %v4633_v9 = vld [vmem:[#allocation2 + $0x1c] ss:$12 sps:$4 sm:$0xff]   ;;  %v5262_v10 = vmov 0.0   ;;  %v167_v11 = vsel %vm159_vm0, %v4629_v4, 0  ;;  %753 = vmatprep.subr.bf16.mxu0 %v4630_v7 }
  0x5c   :  { %4460 = vmatprep.subr.bf16.mxu1 %v5262_v10  ;;  %754 = vmatpush1.bf16.msra.mxu0 %v4632_v8  ;;  %v4635_v12 = vld [vmem:[#allocation2 + $0x18] ss:$12 sps:$4 sm:$0xff]   ;;  %v4636_v13 = vld [vmem:[#allocation2 + $0x34] ss:$12 sps:$4 sm:$0xff]   ;;  %vm5263_vm2 = vmmov 0   ;;  %v128_v59 = vshrl.u32 %v127_v58, 7 }
  0x5d   :  { %755 = vmatprep.subr.bf16.mxu0 %v4633_v9  ;;  %v4638_v14 = vld [vmem:[#allocation2 + $0x30] ss:$12 sps:$4 sm:$0xff]   ;;  %v4639_v15 = vld [vmem:[#allocation2 + $0x4c] ss:$12 sps:$4 sm:$0xff]   ;;  %v4641_v16 = vld [vmem:[#allocation2 + $0x48] ss:$12 sps:$4 sm:$0xff]  }
  0x5e   :  { %3885 = vmatmul.mubr.msk.bf16.vlgmr.msra.gmra.mrb[0].mxu1 %vm155_vm1, %v120_v6  ;;  %v4642_v17 = vld [vmem:[#allocation2 + $0x64] ss:$12 sps:$4 sm:$0xff]   ;;  %v4656_v18 = vld [vmem:[#allocation2 + $0xc8] ss:$12 sps:$4 sm:$0xff]   ;;  %v4644_v20 = vld [vmem:[#allocation2 + $0x60] ss:$12 sps:$4 sm:$0xff]  }
  0x5f   :  { %4461 = vmatpush3.bf16.msra.mxu1 %v167_v11  ;;  %4462 = vmatprep.mubr.msk.bf16.mxu1 %vm5263_vm2, %v5262_v10  ;;  %v4658_v19 = vld [vmem:[#allocation2 + $0x8] ss:$12 sps:$4 sm:$0xff]   ;;  %v4661_v22 = vld [vmem:[#allocation2 + $0xe0] ss:$12 sps:$4 sm:$0xff]   ;;  %v4647_v24 = vld [vmem:[#allocation2 + $0x78] ss:$12 sps:$4 sm:$0xff]  }
  0x60   :  { %756 = vmatpush1.bf16.msra.mxu0 %v4635_v12  ;;  %4274 = vmatprep.subr.bf16.mxu1 %v4656_v18  ;;  %v4645_v21 = vld [vmem:[#allocation2 + $0x7c] ss:$12 sps:$4 sm:$0xff]   ;;  %v4663_v23 = vld [vmem:[#allocation2 + $0x20] ss:$12 sps:$4 sm:$0xff]   ;;  %v4666_v25 = vld [vmem:[#allocation2 + $0xf8] ss:$12 sps:$4 sm:$0xff]  }
  0x61   :  { %757 = vmatprep.subr.bf16.mxu0 %v4636_v13  ;;  %v4648_v26 = vld [vmem:[#allocation2 + $0x94] ss:$12 sps:$4 sm:$0xff]   ;;  %v4668_v27 = vld [vmem:[#allocation2 + $0x38] ss:$12 sps:$4 sm:$0xff]   ;;  %v4650_v28 = vld [vmem:[#allocation2 + $0x90] ss:$12 sps:$4 sm:$0xff]  }
  0x62   :  { %v4671_v29 = vld [vmem:[#allocation2 + $0x110] ss:$12 sps:$4 sm:$0xff]   ;;  %v4651_v31 = vld [vmem:[#allocation2 + $0xac] ss:$12 sps:$4 sm:$0xff]   ;;  %v4653_v32 = vld [vmem:[#allocation2 + $0xa8] ss:$12 sps:$4 sm:$0xff]  }
  0x63   :  { %v4673_v30 = vld [vmem:[#allocation2 + $0x50] ss:$12 sps:$4 sm:$0xff]   ;;  %v4676_v33 = vld [vmem:[#allocation2 + $0x128] ss:$12 sps:$4 sm:$0xff]   ;;  %v4681_v36 = vld [vmem:[#allocation2 + $0x140] ss:$12 sps:$4 sm:$0xff]  }
  0x64   :  { %758 = vmatpush1.bf16.msra.mxu0 %v4638_v14  ;;  %v4654_v34 = vld [vmem:[#allocation2 + $0xc4] ss:$12 sps:$4 sm:$0xff]   ;;  %v4678_v35 = vld [vmem:[#allocation2 + $0x68] ss:$12 sps:$4 sm:$0xff]   ;;  %v4657_v37 = vld [vmem:[#allocation2 + $0xc0] ss:$12 sps:$4 sm:$0xff]  }
  0x65   :  { %759 = vmatprep.subr.bf16.mxu0 %v4639_v15  ;;  %v4659_v38 = vld [vmem:[#allocation2 + $0xdc] ss:$12 sps:$4 sm:$0xff]   ;;  %v4683_v39 = vld [vmem:[#allocation2 + $0x80] ss:$12 sps:$4 sm:$0xff]   ;;  %v4662_v40 = vld [vmem:[#allocation2 + $0xd8] ss:$12 sps:$4 sm:$0xff]  }
  0x66   :  { %4463 = vmatmul.mubr.msk.bf16.vlgmr.msra.gmra.mrb[4].mxu1 %vm155_vm1, %v120_v6  ;;  %v4664_v41 = vld [vmem:[#allocation2 + $0xf4] ss:$12 sps:$4 sm:$0xff]   ;;  %v4667_v42 = vld [vmem:[#allocation2 + $0xf0] ss:$12 sps:$4 sm:$0xff]   ;;  %v4669_v43 = vld [vmem:[#allocation2 + $0x10c] ss:$12 sps:$4 sm:$0xff]  }
  0x67   :  { %4275 = vmatpush3.bf16.msra.mxu1 %v4658_v19  ;;  %v4672_v44 = vld [vmem:[#allocation2 + $0x108] ss:$12 sps:$4 sm:$0xff]   ;;  %v4674_v45 = vld [vmem:[#allocation2 + $0x124] ss:$12 sps:$4 sm:$0xff]   ;;  %v4677_v46 = vld [vmem:[#allocation2 + $0x120] ss:$12 sps:$4 sm:$0xff]  }
  0x68   :  { %760 = vmatpush1.bf16.msra.mxu0 %v4641_v16  ;;  %4276 = vmatprep.subr.bf16.mxu1 %v4661_v22  ;;  %v4679_v47 = vld [vmem:[#allocation2 + $0x13c] ss:$12 sps:$4 sm:$0xff]   ;;  %v4682_v48 = vld [vmem:[#allocation2 + $0x138] ss:$12 sps:$4 sm:$0xff]   ;;  %v4684_v49 = vld [vmem:[#allocation2 + $0x154] ss:$12 sps:$4 sm:$0xff]  }
  0x69   :  { %761 = vmatprep.subr.bf16.mxu0 %v4642_v17  ;;  %v4686_v50 = vld [vmem:[#allocation2 + $0x158] ss:$12 sps:$4 sm:$0xff]   ;;  %v4687_v51 = vld [vmem:[#allocation2 + $0x150] ss:$12 sps:$4 sm:$0xff]   ;;  %v4692_v55 = vld [vmem:[#allocation2 + $0x168] ss:$12 sps:$4 sm:$0xff]  }
  0x6a   :  { %v4688_v52 = vld [vmem:[#allocation2 + $0x98] ss:$12 sps:$4 sm:$0xff]   ;;  %v4691_v54 = vld [vmem:[#allocation2 + $0x170] ss:$12 sps:$4 sm:$0xff]   ;;  %v5452_v60 = vsub.s32 0, %v128_v59  ;;  %v5459_v62 = vsub.s32 1, %v128_v59 }
  0x6b   :  { %4277 = vmatpush3.bf16.msra.mxu1 %v4663_v23  ;;  %v4689_v53 = vld [vmem:[#allocation2 + $0x16c] ss:$12 sps:$4 sm:$0xff]   ;;  %v4693_v56 = vld [vmem:[#allocation2 + $0xb0] ss:$12 sps:$4 sm:$0xff]   ;;  %v5457_v61 = vld [vmem:[%s5658_s2] sm:$0x7] }
  0x6c   :  { %762 = vmatpush1.bf16.msra.mxu0 %v4644_v20  ;;  %4278 = vmatprep.subr.bf16.mxu1 %v4666_v25  ;;  %v4696_v57 = vld [vmem:[#allocation2 + $0x184] ss:$12 sps:$4 sm:$0xff]   ;;  %v130_v63 = vrot.slane %v5457_v61, %v5452_v60  ;;  %v134_v1 = vrot.slane %v5457_v61, %v5459_v62  ;;  %v4694_v12 = vld [vmem:[#allocation2 + $0x180] ss:$12 sps:$4 sm:$0xff]   ;;  %v4697_v13 = vld [vmem:[#allocation2 + $0x188] ss:$12 sps:$4 sm:$0xff]  }
  0x6d   :  { %763 = vmatprep.subr.bf16.mxu0 %v4645_v21  ;;  %v4700_v15 = vld [vmem:[#allocation2 + $0x19c] ss:$12 sps:$4 sm:$0xff]   ;;  %v4698_v18 = vld [vmem:[#allocation2 + $0x198] ss:$12 sps:$4 sm:$0xff]   ;;  %v4701_v19 = vld [vmem:[#allocation2 + $0x1a0] ss:$12 sps:$4 sm:$0xff]  }
  0x6e   :  { %v4704_v21 = vld [vmem:[#allocation2 + $0x1b4] ss:$12 sps:$4 sm:$0xff]   ;;  %v4702_v23 = vld [vmem:[#allocation2 + $0x1b0] ss:$12 sps:$4 sm:$0xff]   ;;  %v4708_v25 = vld [vmem:[#allocation2 + $0x1cc] ss:$12 sps:$4 sm:$0xff]  }
  0x6f   :  { %4279 = vmatpush3.bf16.msra.mxu1 %v4668_v27  ;;  %v4709_v27 = vld [vmem:[#allocation2 + $0x1d0] ss:$12 sps:$4 sm:$0xff]   ;;  %vm3860_vm3 = vcmask 15360  }
  0x70   :  { %764 = vmatpush1.bf16.msra.mxu0 %v4647_v24  ;;  %4280 = vmatprep.subr.bf16.mxu1 %v4671_v29  ;;  %v4705_v24 = vld [vmem:[#allocation2 + $0x1b8] ss:$12 sps:$4 sm:$0xff]   ;;  %v5471_v29 = vsub.s32 2, %v128_v59  ;;  %v4744_v58 = vld [vmem:[#allocation4 + $0x90] ss:$12 sps:$4 sm:$0xff]  }
  0x71   :  { %765 = vmatprep.subr.bf16.mxu0 %v4648_v26  ;;  %v4706_v26 = vld [vmem:[#allocation2 + $0x1c8] ss:$12 sps:$4 sm:$0xff]   ;;  %v4749_v59 = vld [vmem:[#allocation4 + $0xac] ss:$12 sps:$4 sm:$0xff]  }
  0x73   :  { %4281 = vmatpush3.bf16.msra.mxu1 %v4673_v30  ;;  %v4710_v30 = vld [vmem:[#allocation2 + $0x1e0] ss:$12 sps:$4 sm:$0xff]  }
  0x74   :  { %766 = vmatpush1.bf16.msra.mxu0 %v4650_v28  ;;  %4282 = vmatprep.subr.bf16.mxu1 %v4676_v33  ;;  %v4712_v28 = vld [vmem:[#allocation2 + $0x1e4] ss:$12 sps:$4 sm:$0xff]   ;;  %v138_v33 = vrot.slane %v5457_v61, %v5471_v29  ;;  %v4747_v61 = vld [vmem:[#allocation4 + $0xa8] ss:$12 sps:$4 sm:$0xff]  }
  0x75   :  { %767 = vmatprep.subr.bf16.mxu0 %v4651_v31  ;;  %v4713_v31 = vld [vmem:[#allocation2 + $0x1e8] ss:$12 sps:$4 sm:$0xff]  }
  0x77   :  { %4283 = vmatpush3.bf16.msra.mxu1 %v4678_v35  ;;  %v4717_v35 = vld [vmem:[#allocation2 + $0x200] ss:$12 sps:$4 sm:$0xff]  }
  0x78   :  { %768 = vmatpush1.bf16.msra.mxu0 %v4653_v32  ;;  %4284 = vmatprep.subr.bf16.mxu1 %v4681_v36  ;;  %v4716_v32 = vld [vmem:[#allocation2 + $0x1fc] ss:$12 sps:$4 sm:$0xff]   ;;  %v4720_v36 = vld [vmem:[#allocation2 + $0x214] ss:$12 sps:$4 sm:$0xff]  }
  0x79   :  { %769 = vmatprep.subr.bf16.mxu0 %v4654_v34  ;;  %v4714_v34 = vld [vmem:[#allocation2 + $0x1f8] ss:$12 sps:$4 sm:$0xff]  }
  0x7b   :  { %4285 = vmatpush3.bf16.msra.mxu1 %v4683_v39  ;;  %v4721_v39 = vld [vmem:[#allocation2 + $0x218] ss:$12 sps:$4 sm:$0xff]  }
  0x7c   :  { %770 = vmatpush1.bf16.msra.mxu0 %v4657_v37  ;;  %4286 = vmatprep.subr.bf16.mxu1 %v4686_v50  ;;  %v4732_v50 = vld [vmem:[#allocation4 + $0x30] ss:$12 sps:$4 sm:$0xff]  }
  0x7d   :  { %771 = vmatprep.subr.bf16.mxu0 %v4659_v38  ;;  %v4718_v38 = vld [vmem:[#allocation2 + $0x210] ss:$12 sps:$4 sm:$0xff]  }
  0x7f   :  { %4287 = vmatpush3.bf16.msra.mxu1 %v4688_v52  ;;  %v4735_v52 = vld [vmem:[#allocation4 + $0x48] ss:$12 sps:$4 sm:$0xff]  }
  0x80   :  { %772 = vmatpush1.bf16.msra.mxu0 %v4662_v40  ;;  %4288 = vmatprep.subr.bf16.mxu1 %v4691_v54  ;;  %v4724_v40 = vld [vmem:[#allocation2 + $0x22c] ss:$12 sps:$4 sm:$0xff]  }
  0x81   :  { %773 = vmatprep.subr.bf16.mxu0 %v4664_v41  ;;  %v4738_v54 = vld [vmem:[#allocation4 + $0x60] ss:$12 sps:$4 sm:$0xff]  }
  0x83   :  { %4289 = vmatpush3.bf16.msra.mxu1 %v4693_v56  ;;  %v4741_v56 = vld [vmem:[#allocation4 + $0x78] ss:$12 sps:$4 sm:$0xff]  }
  0x84   :  { %774 = vmatpush1.bf16.msra.mxu0 %v4667_v42  ;;  %4466 = vmatprep.subr.bf16.mxu1 %v5262_v10  ;;  %v4722_v42 = vld [vmem:[#allocation2 + $0x228] ss:$12 sps:$4 sm:$0xff]  }
  0x85   :  { %775 = vmatprep.subr.bf16.mxu0 %v4669_v43  ;;  %v4725_v43 = vld [vmem:[#allocation2 + $0x230] ss:$12 sps:$4 sm:$0xff]  }
  0x88   :  { %776 = vmatpush1.bf16.msra.mxu0 %v4672_v44  ;;  %v4728_v44 = vld [vmem:[#allocation4 + $0x4] ss:$12 sps:$4 sm:$0xff]  }
  0x89   :  { %777 = vmatprep.subr.bf16.mxu0 %v4674_v45 }
  0x8c   :  { %778 = vmatpush1.bf16.msra.mxu0 %v4677_v46  ;;  %v4726_v46 = vld [vmem:[#allocation4] ss:$12 sps:$4 sm:$0xff]  }
  0x8d   :  { %779 = vmatprep.subr.bf16.mxu0 %v4679_v47  ;;  %v4731_v47 = vld [vmem:[#allocation4 + $0x1c] ss:$12 sps:$4 sm:$0xff]  }
  0x90   :  { %780 = vmatpush1.bf16.msra.mxu0 %v4682_v48  ;;  %v4729_v48 = vld [vmem:[#allocation4 + $0x18] ss:$12 sps:$4 sm:$0xff]  }
  0x91   :  { %781 = vmatprep.subr.bf16.mxu0 %v4684_v49  ;;  %v4734_v49 = vld [vmem:[#allocation4 + $0x34] ss:$12 sps:$4 sm:$0xff]  }
  0x94   :  { %782 = vmatpush1.bf16.msra.mxu0 %v4687_v51  ;;  %v4737_v51 = vld [vmem:[#allocation4 + $0x4c] ss:$12 sps:$4 sm:$0xff]  }
  0x95   :  { %783 = vmatprep.subr.bf16.mxu0 %v4689_v53  ;;  %v4740_v53 = vld [vmem:[#allocation4 + $0x64] ss:$12 sps:$4 sm:$0xff]  }
  0x98   :  { %784 = vmatpush1.bf16.msra.mxu0 %v4692_v55  ;;  %v4743_v55 = vld [vmem:[#allocation4 + $0x7c] ss:$12 sps:$4 sm:$0xff]  }
  0x99   :  { %794 = vmatprep.subr.bf16.mxu0 %v4696_v57  ;;  %v4746_v57 = vld [vmem:[#allocation4 + $0x94] ss:$12 sps:$4 sm:$0xff]  }
 0x131   :  { %v203_v2 = vpop.f32.mrb[0].mxu1 }
 0x132   :  { %v204_v3 = vadd.f32 %v203_v2, %v130_v63  ;;  %v205_v4 = vpop.f32.mrb[1].mxu1  ;;  %v4752_v63 = vld [vmem:[#allocation4 + $0xc4] ss:$12 sps:$4 sm:$0xff]   ;;  %v4754_v2 = vld [vmem:[#allocation4 + $0x8] ss:$12 sps:$4 sm:$0xff]  }
 0x133   :  { %v206_v5 = vadd.f32 %v205_v4, %v134_v1  ;;  %v207_v6 = vpop.f32.mrb[2].mxu1  ;;  %v4753_v1 = vld [vmem:[#allocation4 + $0xc8] ss:$12 sps:$4 sm:$0xff]   ;;  %v4758_v4 = vld [vmem:[#allocation4 + $0xe0] ss:$12 sps:$4 sm:$0xff]  }
 0x134   :  { %v250_v7 = vmax.f32 %v204_v3, 0.0  ;;  %v208_v8 = vpop.f32.mrb[3].mxu1  ;;  %v4750_v3 = vld [vmem:[#allocation4 + $0xc0] ss:$12 sps:$4 sm:$0xff]  }
 0x135   :  { %v251_v9 = vmax.f32 %v206_v5, 0.0  ;;  %v4757_v5 = vld [vmem:[#allocation4 + $0xdc] ss:$12 sps:$4 sm:$0xff]   ;;  %v4759_v6 = vld [vmem:[#allocation4 + $0x20] ss:$12 sps:$4 sm:$0xff]  }
 0x136   :  { %v253_v14 = vpack.c.bf16 %v250_v7, %v250_v7  ;;  %v4763_v7 = vld [vmem:[#allocation4 + $0xf8] ss:$12 sps:$4 sm:$0xff]  }
 0x137   :  { %v254_v11 = vpack.c.bf16 %v251_v9, %v251_v9  ;;  %v4755_v8 = vld [vmem:[#allocation4 + $0xd8] ss:$12 sps:$4 sm:$0xff]   ;;  %v4762_v9 = vld [vmem:[#allocation4 + $0xf4] ss:$12 sps:$4 sm:$0xff]  }
 0x139   :  { %785 = vmatprep.mubr.bf16.mxu0 %v254_v11  ;;  %867 = vmatprep.mubr.bf16.mxu1 %v254_v11  ;;  %v244_v16 = vpop.f32.mrb[4].mxu1  ;;  %v4764_v11 = vld [vmem:[#allocation4 + $0x38] ss:$12 sps:$4 sm:$0xff]  }
 0x13a   :  { %786 = vmatmul.mubr.bf16.vlgmr.msra.gmra.mrb[0].mxu0 %v253_v14  ;;  %868 = vmatmul.mubr.bf16.vlgmr.msra.gmra.mrb[8].mxu1 %v253_v14  ;;  %v4464_v17 = vpop.f32.mrb[5].mxu1  ;;  %v245_v37 = vadd.f32 %v244_v16, %v138_v33  ;;  %v4767_v14 = vld [vmem:[#allocation4 + $0x10c] ss:$12 sps:$4 sm:$0xff]   ;;  %v4773_v16 = vld [vmem:[#allocation4 + $0x128] ss:$12 sps:$4 sm:$0xff]  }
 0x13b   :  { %795 = vmatpush1.bf16.msra.mxu0 %v4694_v12  ;;  %4467 = vmatpush3.bf16.msra.mxu1 %v4697_v13  ;;  %v247_v20 = vpop.f32.mrb[6].mxu1  ;;  %v4768_v12 = vld [vmem:[#allocation4 + $0x110] ss:$12 sps:$4 sm:$0xff]   ;;  %v4765_v17 = vld [vmem:[#allocation4 + $0x108] ss:$12 sps:$4 sm:$0xff]  }
 0x13c   :  { %796 = vmatprep.subr.bf16.mxu0 %v4700_v15  ;;  %4468 = vmatprep.subr.bf16.mxu1 %v5262_v10  ;;  %v4465_v22 = vpop.f32.mrb[7].mxu1  ;;  %v252_v41 = vmax.f32 %v245_v37, 0.0  ;;  %v4760_v13 = vld [vmem:[#allocation4 + $0xf0] ss:$12 sps:$4 sm:$0xff]   ;;  %v4778_v20 = vld [vmem:[#allocation4 + $0x140] ss:$12 sps:$4 sm:$0xff]  }
 0x13d   :  { %826 = vmatprep.mubr.bf16.mxu0 %v5261_v0  ;;  %4482 = vmatprep.mubr.msk.bf16.mxu1 %vm5263_vm2, %v5262_v10  ;;  %v4769_v15 = vld [vmem:[#allocation4 + $0x50] ss:$12 sps:$4 sm:$0xff]  }
 0x13e   :  { %v255_v45 = vpack.c.bf16 %v252_v41, %v252_v41  ;;  %v4777_v22 = vld [vmem:[#allocation4 + $0x13c] ss:$12 sps:$4 sm:$0xff]  }
 0x13f   :  { %797 = vmatpush1.bf16.msra.mxu0 %v4698_v18  ;;  %4469 = vmatpush3.bf16.msra.mxu1 %v4701_v19  ;;  %v4772_v18 = vld [vmem:[#allocation4 + $0x124] ss:$12 sps:$4 sm:$0xff]   ;;  %v4774_v19 = vld [vmem:[#allocation4 + $0x68] ss:$12 sps:$4 sm:$0xff]  }
 0x140   :  { %798 = vmatprep.subr.bf16.mxu0 %v4704_v21  ;;  %4470 = vmatprep.subr.bf16.mxu1 %v5262_v10  ;;  %v4770_v21 = vld [vmem:[#allocation4 + $0x120] ss:$12 sps:$4 sm:$0xff]   ;;  %v4789_v33 = vld [vmem:[#allocation4 + $0xb0] ss:$12 sps:$4 sm:$0xff]  }
 0x143   :  { %799 = vmatpush1.bf16.msra.mxu0 %v4702_v23  ;;  %4471 = vmatpush3.bf16.msra.mxu1 %v4705_v24  ;;  %v4779_v23 = vld [vmem:[#allocation4 + $0x80] ss:$12 sps:$4 sm:$0xff]   ;;  %v4775_v24 = vld [vmem:[#allocation4 + $0x138] ss:$12 sps:$4 sm:$0xff]  }
 0x144   :  { %800 = vmatprep.subr.bf16.mxu0 %v4708_v25  ;;  %4472 = vmatprep.subr.bf16.mxu1 %v5262_v10  ;;  %v4782_v25 = vld [vmem:[#allocation4 + $0x154] ss:$12 sps:$4 sm:$0xff]  }
 0x147   :  { %801 = vmatpush1.bf16.msra.mxu0 %v4706_v26  ;;  %4473 = vmatpush3.bf16.msra.mxu1 %v4709_v27  ;;  %v4783_v26 = vld [vmem:[#allocation4 + $0x158] ss:$12 sps:$4 sm:$0xff]   ;;  %v4780_v27 = vld [vmem:[#allocation4 + $0x150] ss:$12 sps:$4 sm:$0xff]  }
 0x148   :  { %802 = vmatprep.subr.bf16.mxu0 %v4712_v28  ;;  %4474 = vmatprep.subr.bf16.mxu1 %v5262_v10  ;;  %v4784_v28 = vld [vmem:[#allocation4 + $0x98] ss:$12 sps:$4 sm:$0xff]  }
 0x14b   :  { %803 = vmatpush1.bf16.msra.mxu0 %v4710_v30  ;;  %4475 = vmatpush3.bf16.msra.mxu1 %v4713_v31  ;;  %v4787_v30 = vld [vmem:[#allocation4 + $0x16c] ss:$12 sps:$4 sm:$0xff]   ;;  %v4788_v31 = vld [vmem:[#allocation4 + $0x170] ss:$12 sps:$4 sm:$0xff]  }
 0x14c   :  { %804 = vmatprep.subr.bf16.mxu0 %v4716_v32  ;;  %4476 = vmatprep.subr.bf16.mxu1 %v5262_v10  ;;  %v4785_v32 = vld [vmem:[#allocation4 + $0x168] ss:$12 sps:$4 sm:$0xff]  }
 0x14f   :  { %805 = vmatpush1.bf16.msra.mxu0 %v4714_v34  ;;  %4477 = vmatpush3.bf16.msra.mxu1 %v4717_v35  ;;  %v4792_v34 = vld [vmem:[#allocation4 + $0x184] ss:$12 sps:$4 sm:$0xff]  }
 0x150   :  { %806 = vmatprep.subr.bf16.mxu0 %v4720_v36  ;;  %4478 = vmatprep.subr.bf16.mxu1 %v5262_v10 }
 0x153   :  { %807 = vmatpush1.bf16.msra.mxu0 %v4718_v38  ;;  %4479 = vmatpush3.bf16.msra.mxu1 %v4721_v39 }
 0x154   :  { %808 = vmatprep.subr.bf16.mxu0 %v4724_v40  ;;  %4480 = vmatprep.subr.bf16.mxu1 %v5262_v10  ;;  %v352_v40 = vld [vmem:[%s5660_s4] sm:$0x7] }
 0x155   :  { %v365_v41 = vrot.slane %v352_v40, %v5471_v29 }
 0x157   :  { %809 = vmatpush1.bf16.msra.mxu0 %v4722_v42  ;;  %4481 = vmatpush3.bf16.msra.mxu1 %v4725_v43  ;;  %v357_v42 = vrot.slane %v352_v40, %v5452_v60  ;;  %v361_v43 = vrot.slane %v352_v40, %v5459_v62  ;;  %v4845_v40 = vld [vmem:[#allocation6 + $0xac] ss:$12 sps:$4 sm:$0xff]  }
 0x158   :  { %1418 = vmatprep.subr.bf16.mxu1 %v4728_v44  ;;  %4305 = vmatprep.subr.bf16.mxu0 %v4753_v1  ;;  %v4796_v1 = vld [vmem:[#allocation4 + $0x19c] ss:$12 sps:$4 sm:$0xff]  }
 0x15a   :  { %827 = vmatmul.mubr.bf16.vlgmr.msra.gmra.mrb[0].mxu0 %v255_v45  ;;  %4483 = vmatmul.mubr.bf16.vlgmr.msra.gmra.mrb[12].mxu1 %v255_v45 }
 0x15b   :  { %1419 = vmatpush1.bf16.msra.mxu1 %v4726_v46  ;;  %4306 = vmatpush3.bf16.msra.mxu0 %v4754_v2  ;;  %v4794_v2 = vld [vmem:[#allocation4 + $0x198] ss:$12 sps:$4 sm:$0xff]  }
 0x15c   :  { %1420 = vmatprep.subr.bf16.mxu1 %v4731_v47  ;;  %4307 = vmatprep.subr.bf16.mxu0 %v4758_v4  ;;  %v4800_v4 = vld [vmem:[#allocation4 + $0x1b4] ss:$12 sps:$4 sm:$0xff]  }
 0x15f   :  { %1421 = vmatpush1.bf16.msra.mxu1 %v4729_v48  ;;  %4308 = vmatpush3.bf16.msra.mxu0 %v4759_v6  ;;  %v4801_v6 = vld [vmem:[#allocation4 + $0x1b8] ss:$12 sps:$4 sm:$0xff]  }
 0x160   :  { %1422 = vmatprep.subr.bf16.mxu1 %v4734_v49  ;;  %4309 = vmatprep.subr.bf16.mxu0 %v4763_v7  ;;  %v4804_v7 = vld [vmem:[#allocation4 + $0x1cc] ss:$12 sps:$4 sm:$0xff]  }
 0x163   :  { %1423 = vmatpush1.bf16.msra.mxu1 %v4732_v50  ;;  %4310 = vmatpush3.bf16.msra.mxu0 %v4764_v11  ;;  %v4808_v11 = vld [vmem:[#allocation4 + $0x1e4] ss:$12 sps:$4 sm:$0xff]  }
 0x164   :  { %1424 = vmatprep.subr.bf16.mxu1 %v4737_v51  ;;  %4311 = vmatprep.subr.bf16.mxu0 %v4768_v12  ;;  %v4806_v12 = vld [vmem:[#allocation4 + $0x1e0] ss:$12 sps:$4 sm:$0xff]  }
 0x167   :  { %1425 = vmatpush1.bf16.msra.mxu1 %v4735_v52  ;;  %4312 = vmatpush3.bf16.msra.mxu0 %v4769_v15  ;;  %v4810_v15 = vld [vmem:[#allocation4 + $0x1f8] ss:$12 sps:$4 sm:$0xff]  }
 0x168   :  { %1426 = vmatprep.subr.bf16.mxu1 %v4740_v53  ;;  %4313 = vmatprep.subr.bf16.mxu0 %v4773_v16  ;;  %v4813_v16 = vld [vmem:[#allocation4 + $0x200] ss:$12 sps:$4 sm:$0xff]  }
 0x16b   :  { %1427 = vmatpush1.bf16.msra.mxu1 %v4738_v54  ;;  %4314 = vmatpush3.bf16.msra.mxu0 %v4774_v19  ;;  %v4817_v19 = vld [vmem:[#allocation4 + $0x218] ss:$12 sps:$4 sm:$0xff]  }
 0x16c   :  { %1428 = vmatprep.subr.bf16.mxu1 %v4743_v55  ;;  %4315 = vmatprep.subr.bf16.mxu0 %v4778_v20  ;;  %v4820_v20 = vld [vmem:[#allocation4 + $0x22c] ss:$12 sps:$4 sm:$0xff]  }
 0x16f   :  { %1429 = vmatpush1.bf16.msra.mxu1 %v4741_v56  ;;  %4316 = vmatpush3.bf16.msra.mxu0 %v4779_v23 }
 0x170   :  { %1430 = vmatprep.subr.bf16.mxu1 %v4746_v57  ;;  %4317 = vmatprep.subr.bf16.mxu0 %v4783_v26 }
 0x173   :  { %1431 = vmatpush1.bf16.msra.mxu1 %v4744_v58  ;;  %4318 = vmatpush3.bf16.msra.mxu0 %v4784_v28  ;;  %v4825_v28 = vld [vmem:[#allocation6 + $0x18] ss:$12 sps:$4 sm:$0xff]  }
 0x174   :  { %1432 = vmatprep.subr.bf16.mxu1 %v4749_v59  ;;  %4319 = vmatprep.subr.bf16.mxu0 %v4788_v31  ;;  %v4790_v59 = vld [vmem:[#allocation4 + $0x180] ss:$12 sps:$4 sm:$0xff]   ;;  %v4828_v31 = vld [vmem:[#allocation6 + $0x30] ss:$12 sps:$4 sm:$0xff]  }
 0x177   :  { %1433 = vmatpush1.bf16.msra.mxu1 %v4747_v61  ;;  %4320 = vmatpush3.bf16.msra.mxu0 %v4789_v33  ;;  %v4793_v61 = vld [vmem:[#allocation4 + $0x188] ss:$12 sps:$4 sm:$0xff]  }
 0x178   :  { %1434 = vmatprep.subr.bf16.mxu1 %v4752_v63  ;;  %4486 = vmatprep.subr.bf16.mxu0 %v5262_v10  ;;  %v4831_v33 = vld [vmem:[#allocation6 + $0x48] ss:$12 sps:$4 sm:$0xff]  }
 0x17b   :  { %1435 = vmatpush1.bf16.msra.mxu1 %v4750_v3  ;;  %v4797_v3 = vld [vmem:[#allocation4 + $0x1a0] ss:$12 sps:$4 sm:$0xff]  }
 0x17c   :  { %1436 = vmatprep.subr.bf16.mxu1 %v4757_v5  ;;  %v4798_v5 = vld [vmem:[#allocation4 + $0x1b0] ss:$12 sps:$4 sm:$0xff]  }
 0x17f   :  { %1437 = vmatpush1.bf16.msra.mxu1 %v4755_v8  ;;  %v4802_v8 = vld [vmem:[#allocation4 + $0x1c8] ss:$12 sps:$4 sm:$0xff]  }
 0x180   :  { %1438 = vmatprep.subr.bf16.mxu1 %v4762_v9  ;;  %v4805_v9 = vld [vmem:[#allocation4 + $0x1d0] ss:$12 sps:$4 sm:$0xff]  }
 0x183   :  { %1439 = vmatpush1.bf16.msra.mxu1 %v4760_v13  ;;  %v4809_v13 = vld [vmem:[#allocation4 + $0x1e8] ss:$12 sps:$4 sm:$0xff]  }
 0x184   :  { %1440 = vmatprep.subr.bf16.mxu1 %v4767_v14  ;;  %v4812_v14 = vld [vmem:[#allocation4 + $0x1fc] ss:$12 sps:$4 sm:$0xff]  }
 0x187   :  { %1441 = vmatpush1.bf16.msra.mxu1 %v4765_v17  ;;  %v4816_v17 = vld [vmem:[#allocation4 + $0x214] ss:$12 sps:$4 sm:$0xff]  }
 0x188   :  { %1442 = vmatprep.subr.bf16.mxu1 %v4772_v18  ;;  %v4814_v18 = vld [vmem:[#allocation4 + $0x210] ss:$12 sps:$4 sm:$0xff]  }
 0x18b   :  { %1443 = vmatpush1.bf16.msra.mxu1 %v4770_v21  ;;  %v4818_v21 = vld [vmem:[#allocation4 + $0x228] ss:$12 sps:$4 sm:$0xff]  }
 0x18c   :  { %1444 = vmatprep.subr.bf16.mxu1 %v4777_v22  ;;  %v4821_v22 = vld [vmem:[#allocation4 + $0x230] ss:$12 sps:$4 sm:$0xff]  }
 0x18f   :  { %1445 = vmatpush1.bf16.msra.mxu1 %v4775_v24  ;;  %v4824_v24 = vld [vmem:[#allocation6 + $0x4] ss:$12 sps:$4 sm:$0xff]  }
 0x190   :  { %1446 = vmatprep.subr.bf16.mxu1 %v4782_v25  ;;  %v4822_v25 = vld [vmem:[#allocation6] ss:$12 sps:$4 sm:$0xff]  }
 0x193   :  { %1447 = vmatpush1.bf16.msra.mxu1 %v4780_v27  ;;  %v4827_v27 = vld [vmem:[#allocation6 + $0x1c] ss:$12 sps:$4 sm:$0xff]  }
 0x194   :  { %1448 = vmatprep.subr.bf16.mxu1 %v4787_v30  ;;  %v4830_v30 = vld [vmem:[#allocation6 + $0x34] ss:$12 sps:$4 sm:$0xff]  }
 0x197   :  { %1449 = vmatpush1.bf16.msra.mxu1 %v4785_v32  ;;  %v4833_v32 = vld [vmem:[#allocation6 + $0x4c] ss:$12 sps:$4 sm:$0xff]  }
 0x198   :  { %1459 = vmatprep.subr.bf16.mxu1 %v4792_v34  ;;  %v4836_v34 = vld [vmem:[#allocation6 + $0x64] ss:$12 sps:$4 sm:$0xff]  }
 0x20d   :  { %v4290_v35 = vpop.f32.mrb[8].mxu1 }
 0x20e   :  { %v4291_v36 = vpop.f32.mrb[9].mxu1 }
 0x20f   :  { %v4292_v37 = vadd.f32 %v4291_v36, %v4290_v35  ;;  %v4293_v38 = vpop.f32.mrb[10].mxu1  ;;  %v4834_v35 = vld [vmem:[#allocation6 + $0x60] ss:$12 sps:$4 sm:$0xff]   ;;  %v4839_v36 = vld [vmem:[#allocation6 + $0x7c] ss:$12 sps:$4 sm:$0xff]  }
 0x210   :  { %v4294_v39 = vpop.f32.mrb[11].mxu1  ;;  %v4842_v38 = vld [vmem:[#allocation6 + $0x94] ss:$12 sps:$4 sm:$0xff]  }
 0x211   :  { %v870_v44 = vadd.f32 %v4292_v37, %v365_v41  ;;  %v4837_v37 = vld [vmem:[#allocation6 + $0x78] ss:$12 sps:$4 sm:$0xff]   ;;  %v4840_v39 = vld [vmem:[#allocation6 + $0x90] ss:$12 sps:$4 sm:$0xff]   ;;  %v4843_v41 = vld [vmem:[#allocation6 + $0xa8] ss:$12 sps:$4 sm:$0xff]  }
 0x22d   :  { %v828_v45 = vpop.f32.mrb[0].mxu0  ;;  %v909_v46 = vpop.f32.mrb[12].mxu1 }
 0x22e   :  { %v4586_v47 = vadd.f32 %v828_v45, %v357_v42  ;;  %v5486_v48 = vadd.f32 %v909_v46, %v870_v44  ;;  %v830_v49 = vpop.f32.mrb[1].mxu0  ;;  %v4484_v50 = vpop.f32.mrb[13].mxu1  ;;  %v4848_v42 = vld [vmem:[#allocation6 + $0xc4] ss:$12 sps:$4 sm:$0xff]   ;;  %v4850_v44 = vld [vmem:[#allocation6 + $0x8] ss:$12 sps:$4 sm:$0xff]  }
 0x22f   :  { %v4587_v51 = vadd.f32 %v830_v49, %v361_v43  ;;  %v832_v52 = vpop.f32.mrb[2].mxu0  ;;  %v912_v53 = vpop.f32.mrb[14].mxu1  ;;  %v4849_v43 = vld [vmem:[#allocation6 + $0xc8] ss:$12 sps:$4 sm:$0xff]   ;;  %v4846_v45 = vld [vmem:[#allocation6 + $0xc0] ss:$12 sps:$4 sm:$0xff]  }
 0x230   :  { %v915_v54 = vmax.f32 %v4586_v47, 0.0  ;;  %v833_v55 = vpop.f32.mrb[3].mxu0  ;;  %v4485_v56 = vpop.f32.mrb[15].mxu1  ;;  %v917_v23 = vmax.f32 %v5486_v48, 0.0  ;;  %v4854_v46 = vld [vmem:[#allocation6 + $0xe0] ss:$12 sps:$4 sm:$0xff]  }
 0x231   :  { %v916_v57 = vmax.f32 %v4587_v51, 0.0  ;;  %v4853_v47 = vld [vmem:[#allocation6 + $0xdc] ss:$12 sps:$4 sm:$0xff]   ;;  %v4855_v48 = vld [vmem:[#allocation6 + $0x20] ss:$12 sps:$4 sm:$0xff]  }
 0x232   :  { %v918_v63 = vpack.c.bf16 %v915_v54, %v915_v54  ;;  %v920_v26 = vpack.c.bf16 %v917_v23, %v917_v23  ;;  %v4859_v49 = vld [vmem:[#allocation6 + $0xf8] ss:$12 sps:$4 sm:$0xff]   ;;  %v4858_v51 = vld [vmem:[#allocation6 + $0xf4] ss:$12 sps:$4 sm:$0xff]   ;;  %v4864_v53 = vld [vmem:[#allocation6 + $0x110] ss:$12 sps:$4 sm:$0xff]  }
 0x233   :  { %v919_v58 = vpack.c.bf16 %v916_v57, %v916_v57  ;;  %v4851_v50 = vld [vmem:[#allocation6 + $0xd8] ss:$12 sps:$4 sm:$0xff]   ;;  %v4856_v54 = vld [vmem:[#allocation6 + $0xf0] ss:$12 sps:$4 sm:$0xff]   ;;  %v4869_v57 = vld [vmem:[#allocation6 + $0x128] ss:$12 sps:$4 sm:$0xff]  }
 0x234   :  { %v4860_v52 = vld [vmem:[#allocation6 + $0x38] ss:$12 sps:$4 sm:$0xff]   ;;  %v4865_v56 = vld [vmem:[#allocation6 + $0x50] ss:$12 sps:$4 sm:$0xff]  }
 0x235   :  { %1450 = vmatprep.mubr.bf16.mxu1 %v919_v58  ;;  %1532 = vmatprep.mubr.bf16.mxu0 %v919_v58  ;;  %v4863_v55 = vld [vmem:[#allocation6 + $0x10c] ss:$12 sps:$4 sm:$0xff]   ;;  %v4861_v58 = vld [vmem:[#allocation6 + $0x108] ss:$12 sps:$4 sm:$0xff]  }
 0x236   :  { %1451 = vmatmul.mubr.bf16.vlgmr.msra.gmra.mrb[16].mxu1 %v918_v63  ;;  %1533 = vmatmul.mubr.bf16.vlgmr.msra.gmra.mrb[4].mxu0 %v918_v63  ;;  %v4874_v63 = vld [vmem:[#allocation6 + $0x140] ss:$12 sps:$4 sm:$0xff]  }
 0x237   :  { %1460 = vmatpush1.bf16.msra.mxu1 %v4790_v59  ;;  %4487 = vmatpush3.bf16.msra.mxu0 %v4793_v61  ;;  %v4868_v59 = vld [vmem:[#allocation6 + $0x124] ss:$12 sps:$4 sm:$0xff]   ;;  %v4870_v61 = vld [vmem:[#allocation6 + $0x68] ss:$12 sps:$4 sm:$0xff]  }
 0x238   :  { %1461 = vmatprep.subr.bf16.mxu1 %v4796_v1  ;;  %4488 = vmatprep.subr.bf16.mxu0 %v5262_v10  ;;  %v4866_v1 = vld [vmem:[#allocation6 + $0x120] ss:$12 sps:$4 sm:$0xff]  }
 0x239   :  { %1491 = vmatprep.mubr.bf16.mxu1 %v5261_v0  ;;  %4502 = vmatprep.mubr.msk.bf16.mxu0 %vm5263_vm2, %v5262_v10 }
 0x23b   :  { %1462 = vmatpush1.bf16.msra.mxu1 %v4794_v2  ;;  %4489 = vmatpush3.bf16.msra.mxu0 %v4797_v3  ;;  %v4873_v2 = vld [vmem:[#allocation6 + $0x13c] ss:$12 sps:$4 sm:$0xff]   ;;  %v4875_v3 = vld [vmem:[#allocation6 + $0x80] ss:$12 sps:$4 sm:$0xff]  }
 0x23c   :  { %1463 = vmatprep.subr.bf16.mxu1 %v4800_v4  ;;  %4490 = vmatprep.subr.bf16.mxu0 %v5262_v10  ;;  %v4871_v4 = vld [vmem:[#allocation6 + $0x138] ss:$12 sps:$4 sm:$0xff]  }
 0x23f   :  { %1464 = vmatpush1.bf16.msra.mxu1 %v4798_v5  ;;  %4491 = vmatpush3.bf16.msra.mxu0 %v4801_v6  ;;  %v4878_v5 = vld [vmem:[#allocation6 + $0x154] ss:$12 sps:$4 sm:$0xff]   ;;  %v4879_v6 = vld [vmem:[#allocation6 + $0x158] ss:$12 sps:$4 sm:$0xff]  }
 0x240   :  { %1465 = vmatprep.subr.bf16.mxu1 %v4804_v7  ;;  %4492 = vmatprep.subr.bf16.mxu0 %v5262_v10  ;;  %v4876_v7 = vld [vmem:[#allocation6 + $0x150] ss:$12 sps:$4 sm:$0xff]  }
 0x243   :  { %1466 = vmatpush1.bf16.msra.mxu1 %v4802_v8  ;;  %4493 = vmatpush3.bf16.msra.mxu0 %v4805_v9  ;;  %v4880_v8 = vld [vmem:[#allocation6 + $0x98] ss:$12 sps:$4 sm:$0xff]  }
 0x244   :  { %1467 = vmatprep.subr.bf16.mxu1 %v4808_v11  ;;  %4494 = vmatprep.subr.bf16.mxu0 %v5262_v10  ;;  %v4883_v9 = vld [vmem:[#allocation6 + $0x16c] ss:$12 sps:$4 sm:$0xff]   ;;  %v4884_v11 = vld [vmem:[#allocation6 + $0x170] ss:$12 sps:$4 sm:$0xff]  }
 0x247   :  { %1468 = vmatpush1.bf16.msra.mxu1 %v4806_v12  ;;  %4495 = vmatpush3.bf16.msra.mxu0 %v4809_v13  ;;  %v4881_v12 = vld [vmem:[#allocation6 + $0x168] ss:$12 sps:$4 sm:$0xff]   ;;  %v4885_v13 = vld [vmem:[#allocation6 + $0xb0] ss:$12 sps:$4 sm:$0xff]  }
 0x248   :  { %1469 = vmatprep.subr.bf16.mxu1 %v4812_v14  ;;  %4496 = vmatprep.subr.bf16.mxu0 %v5262_v10  ;;  %v4888_v14 = vld [vmem:[#allocation6 + $0x184] ss:$12 sps:$4 sm:$0xff]  }
 0x24b   :  { %1470 = vmatpush1.bf16.msra.mxu1 %v4810_v15  ;;  %4497 = vmatpush3.bf16.msra.mxu0 %v4813_v16 }
 0x24c   :  { %1471 = vmatprep.subr.bf16.mxu1 %v4816_v17  ;;  %4498 = vmatprep.subr.bf16.mxu0 %v5262_v10 }
 0x24f   :  { %1472 = vmatpush1.bf16.msra.mxu1 %v4814_v18  ;;  %4499 = vmatpush3.bf16.msra.mxu0 %v4817_v19 }
 0x250   :  { %1473 = vmatprep.subr.bf16.mxu1 %v4820_v20  ;;  %4500 = vmatprep.subr.bf16.mxu0 %v5262_v10  ;;  %v1017_v20 = vld [vmem:[%s5662_s6] sm:$0x7] }
 0x251   :  { %v1026_v23 = vrot.slane %v1017_v20, %v5459_v62 }
 0x253   :  { %1474 = vmatpush1.bf16.msra.mxu1 %v4818_v21  ;;  %4501 = vmatpush3.bf16.msra.mxu0 %v4821_v22  ;;  %v1030_v21 = vrot.slane %v1017_v20, %v5471_v29  ;;  %v1022_v22 = vrot.slane %v1017_v20, %v5452_v60  ;;  %v4941_v20 = vld [vmem:[#allocation7 + $0xac] ss:$12 sps:$4 sm:$0xff]  }
 0x254   :  { %2083 = vmatprep.subr.bf16.mxu0 %v4824_v24  ;;  %4336 = vmatprep.subr.bf16.mxu1 %v4849_v43  ;;  %v4892_v43 = vld [vmem:[#allocation6 + $0x19c] ss:$12 sps:$4 sm:$0xff]  }
 0x256   :  { %1492 = vmatmul.mubr.bf16.vlgmr.msra.gmra.mrb[16].mxu1 %v920_v26  ;;  %4503 = vmatmul.mubr.bf16.vlgmr.msra.gmra.mrb[8].mxu0 %v920_v26 }
 0x257   :  { %2084 = vmatpush1.bf16.msra.mxu0 %v4822_v25  ;;  %4337 = vmatpush3.bf16.msra.mxu1 %v4850_v44  ;;  %v4890_v44 = vld [vmem:[#allocation6 + $0x198] ss:$12 sps:$4 sm:$0xff]  }
 0x258   :  { %2085 = vmatprep.subr.bf16.mxu0 %v4827_v27  ;;  %4338 = vmatprep.subr.bf16.mxu1 %v4854_v46  ;;  %v4896_v46 = vld [vmem:[#allocation6 + $0x1b4] ss:$12 sps:$4 sm:$0xff]  }
 0x25b   :  { %2086 = vmatpush1.bf16.msra.mxu0 %v4825_v28  ;;  %4339 = vmatpush3.bf16.msra.mxu1 %v4855_v48  ;;  %v4897_v48 = vld [vmem:[#allocation6 + $0x1b8] ss:$12 sps:$4 sm:$0xff]  }
 0x25c   :  { %2087 = vmatprep.subr.bf16.mxu0 %v4830_v30  ;;  %4340 = vmatprep.subr.bf16.mxu1 %v4859_v49  ;;  %v4900_v49 = vld [vmem:[#allocation6 + $0x1cc] ss:$12 sps:$4 sm:$0xff]  }
 0x25f   :  { %2088 = vmatpush1.bf16.msra.mxu0 %v4828_v31  ;;  %4341 = vmatpush3.bf16.msra.mxu1 %v4860_v52  ;;  %v4904_v52 = vld [vmem:[#allocation6 + $0x1e4] ss:$12 sps:$4 sm:$0xff]  }
 0x260   :  { %2089 = vmatprep.subr.bf16.mxu0 %v4833_v32  ;;  %4342 = vmatprep.subr.bf16.mxu1 %v4864_v53  ;;  %v4902_v53 = vld [vmem:[#allocation6 + $0x1e0] ss:$12 sps:$4 sm:$0xff]  }
 0x263   :  { %2090 = vmatpush1.bf16.msra.mxu0 %v4831_v33  ;;  %4343 = vmatpush3.bf16.msra.mxu1 %v4865_v56  ;;  %v4906_v56 = vld [vmem:[#allocation6 + $0x1f8] ss:$12 sps:$4 sm:$0xff]  }
 0x264   :  { %2091 = vmatprep.subr.bf16.mxu0 %v4836_v34  ;;  %4344 = vmatprep.subr.bf16.mxu1 %v4869_v57  ;;  %v4909_v57 = vld [vmem:[#allocation6 + $0x200] ss:$12 sps:$4 sm:$0xff]  }
 0x267   :  { %2092 = vmatpush1.bf16.msra.mxu0 %v4834_v35  ;;  %4345 = vmatpush3.bf16.msra.mxu1 %v4870_v61  ;;  %v4913_v61 = vld [vmem:[#allocation6 + $0x218] ss:$12 sps:$4 sm:$0xff]  }
 0x268   :  { %2093 = vmatprep.subr.bf16.mxu0 %v4839_v36  ;;  %4346 = vmatprep.subr.bf16.mxu1 %v4874_v63  ;;  %v4916_v63 = vld [vmem:[#allocation6 + $0x22c] ss:$12 sps:$4 sm:$0xff]  }
 0x26b   :  { %2094 = vmatpush1.bf16.msra.mxu0 %v4837_v37  ;;  %4347 = vmatpush3.bf16.msra.mxu1 %v4875_v3 }
 0x26c   :  { %2095 = vmatprep.subr.bf16.mxu0 %v4842_v38  ;;  %4348 = vmatprep.subr.bf16.mxu1 %v4879_v6 }
 0x26f   :  { %2096 = vmatpush1.bf16.msra.mxu0 %v4840_v39  ;;  %4349 = vmatpush3.bf16.msra.mxu1 %v4880_v8  ;;  %v4921_v8 = vld [vmem:[#allocation7 + $0x18] ss:$12 sps:$4 sm:$0xff]  }
 0x270   :  { %2097 = vmatprep.subr.bf16.mxu0 %v4845_v40  ;;  %4350 = vmatprep.subr.bf16.mxu1 %v4884_v11  ;;  %v4886_v40 = vld [vmem:[#allocation6 + $0x180] ss:$12 sps:$4 sm:$0xff]   ;;  %v4924_v11 = vld [vmem:[#allocation7 + $0x30] ss:$12 sps:$4 sm:$0xff]  }
 0x273   :  { %2098 = vmatpush1.bf16.msra.mxu0 %v4843_v41  ;;  %4351 = vmatpush3.bf16.msra.mxu1 %v4885_v13  ;;  %v4889_v41 = vld [vmem:[#allocation6 + $0x188] ss:$12 sps:$4 sm:$0xff]  }
 0x274   :  { %2099 = vmatprep.subr.bf16.mxu0 %v4848_v42  ;;  %4506 = vmatprep.subr.bf16.mxu1 %v5262_v10  ;;  %v4927_v13 = vld [vmem:[#allocation7 + $0x48] ss:$12 sps:$4 sm:$0xff]  }
 0x277   :  { %2100 = vmatpush1.bf16.msra.mxu0 %v4846_v45  ;;  %v4893_v45 = vld [vmem:[#allocation6 + $0x1a0] ss:$12 sps:$4 sm:$0xff]  }
 0x278   :  { %2101 = vmatprep.subr.bf16.mxu0 %v4853_v47  ;;  %v4894_v47 = vld [vmem:[#allocation6 + $0x1b0] ss:$12 sps:$4 sm:$0xff]  }
 0x27b   :  { %2102 = vmatpush1.bf16.msra.mxu0 %v4851_v50  ;;  %v4898_v50 = vld [vmem:[#allocation6 + $0x1c8] ss:$12 sps:$4 sm:$0xff]  }
 0x27c   :  { %2103 = vmatprep.subr.bf16.mxu0 %v4858_v51  ;;  %v4901_v51 = vld [vmem:[#allocation6 + $0x1d0] ss:$12 sps:$4 sm:$0xff]  }
 0x27f   :  { %2104 = vmatpush1.bf16.msra.mxu0 %v4856_v54  ;;  %v4905_v54 = vld [vmem:[#allocation6 + $0x1e8] ss:$12 sps:$4 sm:$0xff]  }
 0x280   :  { %2105 = vmatprep.subr.bf16.mxu0 %v4863_v55  ;;  %v4908_v55 = vld [vmem:[#allocation6 + $0x1fc] ss:$12 sps:$4 sm:$0xff]  }
 0x283   :  { %2106 = vmatpush1.bf16.msra.mxu0 %v4861_v58  ;;  %v4912_v58 = vld [vmem:[#allocation6 + $0x214] ss:$12 sps:$4 sm:$0xff]  }
 0x284   :  { %2107 = vmatprep.subr.bf16.mxu0 %v4868_v59  ;;  %v4910_v59 = vld [vmem:[#allocation6 + $0x210] ss:$12 sps:$4 sm:$0xff]  }
 0x287   :  { %2108 = vmatpush1.bf16.msra.mxu0 %v4866_v1  ;;  %v4914_v1 = vld [vmem:[#allocation6 + $0x228] ss:$12 sps:$4 sm:$0xff]  }
 0x288   :  { %2109 = vmatprep.subr.bf16.mxu0 %v4873_v2  ;;  %v4917_v2 = vld [vmem:[#allocation6 + $0x230] ss:$12 sps:$4 sm:$0xff]  }
 0x28b   :  { %2110 = vmatpush1.bf16.msra.mxu0 %v4871_v4  ;;  %v4920_v4 = vld [vmem:[#allocation7 + $0x4] ss:$12 sps:$4 sm:$0xff]  }
 0x28c   :  { %2111 = vmatprep.subr.bf16.mxu0 %v4878_v5  ;;  %v4918_v5 = vld [vmem:[#allocation7] ss:$12 sps:$4 sm:$0xff]  }
 0x28f   :  { %2112 = vmatpush1.bf16.msra.mxu0 %v4876_v7  ;;  %v4923_v7 = vld [vmem:[#allocation7 + $0x1c] ss:$12 sps:$4 sm:$0xff]  }
 0x290   :  { %2113 = vmatprep.subr.bf16.mxu0 %v4883_v9  ;;  %v4926_v9 = vld [vmem:[#allocation7 + $0x34] ss:$12 sps:$4 sm:$0xff]  }
 0x293   :  { %2114 = vmatpush1.bf16.msra.mxu0 %v4881_v12  ;;  %v4929_v12 = vld [vmem:[#allocation7 + $0x4c] ss:$12 sps:$4 sm:$0xff]  }
 0x294   :  { %2124 = vmatprep.subr.bf16.mxu0 %v4888_v14  ;;  %v4932_v14 = vld [vmem:[#allocation7 + $0x64] ss:$12 sps:$4 sm:$0xff]  }
 0x309   :  { %v4321_v15 = vpop.f32.mrb[4].mxu0 }
 0x30a   :  { %v4322_v16 = vpop.f32.mrb[5].mxu0 }
 0x30b   :  { %v4323_v17 = vadd.f32 %v4322_v16, %v4321_v15  ;;  %v4324_v18 = vpop.f32.mrb[6].mxu0  ;;  %v4930_v15 = vld [vmem:[#allocation7 + $0x60] ss:$12 sps:$4 sm:$0xff]   ;;  %v4935_v16 = vld [vmem:[#allocation7 + $0x7c] ss:$12 sps:$4 sm:$0xff]  }
 0x30c   :  { %v4325_v19 = vpop.f32.mrb[7].mxu0  ;;  %v4938_v18 = vld [vmem:[#allocation7 + $0x94] ss:$12 sps:$4 sm:$0xff]  }
 0x30d   :  { %v1535_v24 = vadd.f32 %v4323_v17, %v1030_v21  ;;  %v4933_v17 = vld [vmem:[#allocation7 + $0x78] ss:$12 sps:$4 sm:$0xff]   ;;  %v4936_v19 = vld [vmem:[#allocation7 + $0x90] ss:$12 sps:$4 sm:$0xff]   ;;  %v4939_v21 = vld [vmem:[#allocation7 + $0xa8] ss:$12 sps:$4 sm:$0xff]  }
 0x329   :  { %v1493_v25 = vpop.f32.mrb[16].mxu1  ;;  %v1574_v26 = vpop.f32.mrb[8].mxu0 }
 0x32a   :  { %v4588_v27 = vadd.f32 %v1493_v25, %v1022_v22  ;;  %v5506_v28 = vadd.f32 %v1574_v26, %v1535_v24  ;;  %v1495_v30 = vpop.f32.mrb[17].mxu1  ;;  %v4504_v31 = vpop.f32.mrb[9].mxu0  ;;  %v4944_v22 = vld [vmem:[#allocation7 + $0xc4] ss:$12 sps:$4 sm:$0xff]   ;;  %v4946_v24 = vld [vmem:[#allocation7 + $0x8] ss:$12 sps:$4 sm:$0xff]  }
 0x32b   :  { %v4589_v32 = vadd.f32 %v1495_v30, %v1026_v23  ;;  %v1497_v33 = vpop.f32.mrb[18].mxu1  ;;  %v1577_v34 = vpop.f32.mrb[10].mxu0  ;;  %v4945_v23 = vld [vmem:[#allocation7 + $0xc8] ss:$12 sps:$4 sm:$0xff]   ;;  %v4942_v25 = vld [vmem:[#allocation7 + $0xc0] ss:$12 sps:$4 sm:$0xff]  }
 0x32c   :  { %v1580_v35 = vmax.f32 %v4588_v27, 0.0  ;;  %v1498_v36 = vpop.f32.mrb[19].mxu1  ;;  %v4505_v37 = vpop.f32.mrb[11].mxu0  ;;  %v1582_v3 = vmax.f32 %v5506_v28, 0.0  ;;  %v4950_v26 = vld [vmem:[#allocation7 + $0xe0] ss:$12 sps:$4 sm:$0xff]  }
 0x32d   :  { %v1581_v38 = vmax.f32 %v4589_v32, 0.0  ;;  %v4949_v27 = vld [vmem:[#allocation7 + $0xdc] ss:$12 sps:$4 sm:$0xff]   ;;  %v4951_v28 = vld [vmem:[#allocation7 + $0x20] ss:$12 sps:$4 sm:$0xff]  }
 0x32e   :  { %v1583_v42 = vpack.c.bf16 %v1580_v35, %v1580_v35  ;;  %v1585_v6 = vpack.c.bf16 %v1582_v3, %v1582_v3  ;;  %v4955_v30 = vld [vmem:[#allocation7 + $0xf8] ss:$12 sps:$4 sm:$0xff]   ;;  %v4954_v32 = vld [vmem:[#allocation7 + $0xf4] ss:$12 sps:$4 sm:$0xff]   ;;  %v4960_v34 = vld [vmem:[#allocation7 + $0x110] ss:$12 sps:$4 sm:$0xff]  }
 0x32f   :  { %v1584_v39 = vpack.c.bf16 %v1581_v38, %v1581_v38  ;;  %v4947_v31 = vld [vmem:[#allocation7 + $0xd8] ss:$12 sps:$4 sm:$0xff]   ;;  %v4952_v35 = vld [vmem:[#allocation7 + $0xf0] ss:$12 sps:$4 sm:$0xff]   ;;  %v4965_v38 = vld [vmem:[#allocation7 + $0x128] ss:$12 sps:$4 sm:$0xff]  }
 0x330   :  { %v4956_v33 = vld [vmem:[#allocation7 + $0x38] ss:$12 sps:$4 sm:$0xff]   ;;  %v4961_v37 = vld [vmem:[#allocation7 + $0x50] ss:$12 sps:$4 sm:$0xff]  }
 0x331   :  { %2115 = vmatprep.mubr.bf16.mxu0 %v1584_v39  ;;  %2197 = vmatprep.mubr.bf16.mxu1 %v1584_v39  ;;  %v4959_v36 = vld [vmem:[#allocation7 + $0x10c] ss:$12 sps:$4 sm:$0xff]   ;;  %v4957_v39 = vld [vmem:[#allocation7 + $0x108] ss:$12 sps:$4 sm:$0xff]  }
 0x332   :  { %2116 = vmatmul.mubr.bf16.vlgmr.msra.gmra.mrb[12].mxu0 %v1583_v42  ;;  %2198 = vmatmul.mubr.bf16.vlgmr.msra.gmra.mrb[20].mxu1 %v1583_v42  ;;  %v4970_v42 = vld [vmem:[#allocation7 + $0x140] ss:$12 sps:$4 sm:$0xff]  }
 0x333   :  { %2125 = vmatpush1.bf16.msra.mxu0 %v4886_v40  ;;  %4507 = vmatpush3.bf16.msra.mxu1 %v4889_v41  ;;  %v4964_v40 = vld [vmem:[#allocation7 + $0x124] ss:$12 sps:$4 sm:$0xff]   ;;  %v4966_v41 = vld [vmem:[#allocation7 + $0x68] ss:$12 sps:$4 sm:$0xff]  }
 0x334   :  { %2126 = vmatprep.subr.bf16.mxu0 %v4892_v43  ;;  %4508 = vmatprep.subr.bf16.mxu1 %v5262_v10  ;;  %v4962_v43 = vld [vmem:[#allocation7 + $0x120] ss:$12 sps:$4 sm:$0xff]  }
 0x335   :  { %2156 = vmatprep.mubr.bf16.mxu0 %v5261_v0  ;;  %4522 = vmatprep.mubr.msk.bf16.mxu1 %vm5263_vm2, %v5262_v10 }
 0x337   :  { %2127 = vmatpush1.bf16.msra.mxu0 %v4890_v44  ;;  %4509 = vmatpush3.bf16.msra.mxu1 %v4893_v45  ;;  %v4969_v44 = vld [vmem:[#allocation7 + $0x13c] ss:$12 sps:$4 sm:$0xff]   ;;  %v4971_v45 = vld [vmem:[#allocation7 + $0x80] ss:$12 sps:$4 sm:$0xff]  }
 0x338   :  { %2128 = vmatprep.subr.bf16.mxu0 %v4896_v46  ;;  %4510 = vmatprep.subr.bf16.mxu1 %v5262_v10  ;;  %v4967_v46 = vld [vmem:[#allocation7 + $0x138] ss:$12 sps:$4 sm:$0xff]  }
 0x33b   :  { %2129 = vmatpush1.bf16.msra.mxu0 %v4894_v47  ;;  %4511 = vmatpush3.bf16.msra.mxu1 %v4897_v48  ;;  %v4974_v47 = vld [vmem:[#allocation7 + $0x154] ss:$12 sps:$4 sm:$0xff]   ;;  %v4975_v48 = vld [vmem:[#allocation7 + $0x158] ss:$12 sps:$4 sm:$0xff]  }
 0x33c   :  { %2130 = vmatprep.subr.bf16.mxu0 %v4900_v49  ;;  %4512 = vmatprep.subr.bf16.mxu1 %v5262_v10  ;;  %v4972_v49 = vld [vmem:[#allocation7 + $0x150] ss:$12 sps:$4 sm:$0xff]  }
 0x33f   :  { %2131 = vmatpush1.bf16.msra.mxu0 %v4898_v50  ;;  %4513 = vmatpush3.bf16.msra.mxu1 %v4901_v51  ;;  %v4976_v50 = vld [vmem:[#allocation7 + $0x98] ss:$12 sps:$4 sm:$0xff]  }
 0x340   :  { %2132 = vmatprep.subr.bf16.mxu0 %v4904_v52  ;;  %4514 = vmatprep.subr.bf16.mxu1 %v5262_v10  ;;  %v4979_v51 = vld [vmem:[#allocation7 + $0x16c] ss:$12 sps:$4 sm:$0xff]   ;;  %v4980_v52 = vld [vmem:[#allocation7 + $0x170] ss:$12 sps:$4 sm:$0xff]  }
 0x343   :  { %2133 = vmatpush1.bf16.msra.mxu0 %v4902_v53  ;;  %4515 = vmatpush3.bf16.msra.mxu1 %v4905_v54  ;;  %v4977_v53 = vld [vmem:[#allocation7 + $0x168] ss:$12 sps:$4 sm:$0xff]   ;;  %v4981_v54 = vld [vmem:[#allocation7 + $0xb0] ss:$12 sps:$4 sm:$0xff]  }
 0x344   :  { %2134 = vmatprep.subr.bf16.mxu0 %v4908_v55  ;;  %4516 = vmatprep.subr.bf16.mxu1 %v5262_v10  ;;  %v4984_v55 = vld [vmem:[#allocation7 + $0x184] ss:$12 sps:$4 sm:$0xff]  }
 0x347   :  { %2135 = vmatpush1.bf16.msra.mxu0 %v4906_v56  ;;  %4517 = vmatpush3.bf16.msra.mxu1 %v4909_v57 }
 0x348   :  { %2136 = vmatprep.subr.bf16.mxu0 %v4912_v58  ;;  %4518 = vmatprep.subr.bf16.mxu1 %v5262_v10 }
 0x34b   :  { %2137 = vmatpush1.bf16.msra.mxu0 %v4910_v59  ;;  %4519 = vmatpush3.bf16.msra.mxu1 %v4913_v61 }
 0x34c   :  { %2138 = vmatprep.subr.bf16.mxu0 %v4916_v63  ;;  %4520 = vmatprep.subr.bf16.mxu1 %v5262_v10  ;;  %v1682_v63 = vld [vmem:[%s5664_s8] sm:$0x7] }
 0x34d   :  { %v1691_v3 = vrot.slane %v1682_v63, %v5459_v62 }
 0x34f   :  { %2139 = vmatpush1.bf16.msra.mxu0 %v4914_v1  ;;  %4521 = vmatpush3.bf16.msra.mxu1 %v4917_v2  ;;  %v1695_v1 = vrot.slane %v1682_v63, %v5471_v29  ;;  %v1687_v2 = vrot.slane %v1682_v63, %v5452_v60  ;;  %v5037_v63 = vld [vmem:[#allocation9 + $0xac] ss:$12 sps:$4 sm:$0xff]  }
 0x350   :  { %2748 = vmatprep.subr.bf16.mxu1 %v4920_v4  ;;  %4367 = vmatprep.subr.bf16.mxu0 %v4945_v23  ;;  %v4988_v23 = vld [vmem:[#allocation7 + $0x19c] ss:$12 sps:$4 sm:$0xff]  }
 0x352   :  { %2157 = vmatmul.mubr.bf16.vlgmr.msra.gmra.mrb[12].mxu0 %v1585_v6  ;;  %4523 = vmatmul.mubr.bf16.vlgmr.msra.gmra.mrb[24].mxu1 %v1585_v6 }
 0x353   :  { %2749 = vmatpush1.bf16.msra.mxu1 %v4918_v5  ;;  %4368 = vmatpush3.bf16.msra.mxu0 %v4946_v24  ;;  %v4986_v24 = vld [vmem:[#allocation7 + $0x198] ss:$12 sps:$4 sm:$0xff]  }
 0x354   :  { %2750 = vmatprep.subr.bf16.mxu1 %v4923_v7  ;;  %4369 = vmatprep.subr.bf16.mxu0 %v4950_v26  ;;  %v4992_v26 = vld [vmem:[#allocation7 + $0x1b4] ss:$12 sps:$4 sm:$0xff]  }
 0x357   :  { %2751 = vmatpush1.bf16.msra.mxu1 %v4921_v8  ;;  %4370 = vmatpush3.bf16.msra.mxu0 %v4951_v28  ;;  %v4993_v28 = vld [vmem:[#allocation7 + $0x1b8] ss:$12 sps:$4 sm:$0xff]  }
 0x358   :  { %2752 = vmatprep.subr.bf16.mxu1 %v4926_v9  ;;  %4371 = vmatprep.subr.bf16.mxu0 %v4955_v30  ;;  %v4996_v30 = vld [vmem:[#allocation7 + $0x1cc] ss:$12 sps:$4 sm:$0xff]  }
 0x35b   :  { %2753 = vmatpush1.bf16.msra.mxu1 %v4924_v11  ;;  %4372 = vmatpush3.bf16.msra.mxu0 %v4956_v33  ;;  %v5000_v33 = vld [vmem:[#allocation7 + $0x1e4] ss:$12 sps:$4 sm:$0xff]  }
 0x35c   :  { %2754 = vmatprep.subr.bf16.mxu1 %v4929_v12  ;;  %4373 = vmatprep.subr.bf16.mxu0 %v4960_v34  ;;  %v4998_v34 = vld [vmem:[#allocation7 + $0x1e0] ss:$12 sps:$4 sm:$0xff]  }
 0x35f   :  { %2755 = vmatpush1.bf16.msra.mxu1 %v4927_v13  ;;  %4374 = vmatpush3.bf16.msra.mxu0 %v4961_v37  ;;  %v5002_v37 = vld [vmem:[#allocation7 + $0x1f8] ss:$12 sps:$4 sm:$0xff]  }
 0x360   :  { %2756 = vmatprep.subr.bf16.mxu1 %v4932_v14  ;;  %4375 = vmatprep.subr.bf16.mxu0 %v4965_v38  ;;  %v5005_v38 = vld [vmem:[#allocation7 + $0x200] ss:$12 sps:$4 sm:$0xff]  }
 0x363   :  { %2757 = vmatpush1.bf16.msra.mxu1 %v4930_v15  ;;  %4376 = vmatpush3.bf16.msra.mxu0 %v4966_v41  ;;  %v5009_v41 = vld [vmem:[#allocation7 + $0x218] ss:$12 sps:$4 sm:$0xff]  }
 0x364   :  { %2758 = vmatprep.subr.bf16.mxu1 %v4935_v16  ;;  %4377 = vmatprep.subr.bf16.mxu0 %v4970_v42  ;;  %v5012_v42 = vld [vmem:[#allocation7 + $0x22c] ss:$12 sps:$4 sm:$0xff]  }
 0x367   :  { %2759 = vmatpush1.bf16.msra.mxu1 %v4933_v17  ;;  %4378 = vmatpush3.bf16.msra.mxu0 %v4971_v45 }
 0x368   :  { %2760 = vmatprep.subr.bf16.mxu1 %v4938_v18  ;;  %4379 = vmatprep.subr.bf16.mxu0 %v4975_v48 }
 0x36b   :  { %2761 = vmatpush1.bf16.msra.mxu1 %v4936_v19  ;;  %4380 = vmatpush3.bf16.msra.mxu0 %v4976_v50  ;;  %v5017_v50 = vld [vmem:[#allocation9 + $0x18] ss:$12 sps:$4 sm:$0xff]  }
 0x36c   :  { %2762 = vmatprep.subr.bf16.mxu1 %v4941_v20  ;;  %4381 = vmatprep.subr.bf16.mxu0 %v4980_v52  ;;  %v4982_v20 = vld [vmem:[#allocation7 + $0x180] ss:$12 sps:$4 sm:$0xff]   ;;  %v5020_v52 = vld [vmem:[#allocation9 + $0x30] ss:$12 sps:$4 sm:$0xff]  }
 0x36f   :  { %2763 = vmatpush1.bf16.msra.mxu1 %v4939_v21  ;;  %4382 = vmatpush3.bf16.msra.mxu0 %v4981_v54  ;;  %v4985_v21 = vld [vmem:[#allocation7 + $0x188] ss:$12 sps:$4 sm:$0xff]  }
 0x370   :  { %2764 = vmatprep.subr.bf16.mxu1 %v4944_v22  ;;  %4526 = vmatprep.subr.bf16.mxu0 %v5262_v10  ;;  %v5023_v54 = vld [vmem:[#allocation9 + $0x48] ss:$12 sps:$4 sm:$0xff]  }
 0x373   :  { %2765 = vmatpush1.bf16.msra.mxu1 %v4942_v25  ;;  %v4989_v25 = vld [vmem:[#allocation7 + $0x1a0] ss:$12 sps:$4 sm:$0xff]  }
 0x374   :  { %2766 = vmatprep.subr.bf16.mxu1 %v4949_v27  ;;  %v4990_v27 = vld [vmem:[#allocation7 + $0x1b0] ss:$12 sps:$4 sm:$0xff]  }
 0x377   :  { %2767 = vmatpush1.bf16.msra.mxu1 %v4947_v31  ;;  %v4994_v31 = vld [vmem:[#allocation7 + $0x1c8] ss:$12 sps:$4 sm:$0xff]  }
 0x378   :  { %2768 = vmatprep.subr.bf16.mxu1 %v4954_v32  ;;  %v4997_v32 = vld [vmem:[#allocation7 + $0x1d0] ss:$12 sps:$4 sm:$0xff]  }
 0x37b   :  { %2769 = vmatpush1.bf16.msra.mxu1 %v4952_v35  ;;  %v5001_v35 = vld [vmem:[#allocation7 + $0x1e8] ss:$12 sps:$4 sm:$0xff]  }
 0x37c   :  { %2770 = vmatprep.subr.bf16.mxu1 %v4959_v36  ;;  %v5004_v36 = vld [vmem:[#allocation7 + $0x1fc] ss:$12 sps:$4 sm:$0xff]  }
 0x37f   :  { %2771 = vmatpush1.bf16.msra.mxu1 %v4957_v39  ;;  %v5008_v39 = vld [vmem:[#allocation7 + $0x214] ss:$12 sps:$4 sm:$0xff]  }
 0x380   :  { %2772 = vmatprep.subr.bf16.mxu1 %v4964_v40  ;;  %v5006_v40 = vld [vmem:[#allocation7 + $0x210] ss:$12 sps:$4 sm:$0xff]  }
 0x383   :  { %2773 = vmatpush1.bf16.msra.mxu1 %v4962_v43  ;;  %v5010_v43 = vld [vmem:[#allocation7 + $0x228] ss:$12 sps:$4 sm:$0xff]  }
 0x384   :  { %2774 = vmatprep.subr.bf16.mxu1 %v4969_v44  ;;  %v5013_v44 = vld [vmem:[#allocation7 + $0x230] ss:$12 sps:$4 sm:$0xff]  }
 0x387   :  { %2775 = vmatpush1.bf16.msra.mxu1 %v4967_v46  ;;  %v5016_v46 = vld [vmem:[#allocation9 + $0x4] ss:$12 sps:$4 sm:$0xff]  }
 0x388   :  { %2776 = vmatprep.subr.bf16.mxu1 %v4974_v47  ;;  %v5014_v47 = vld [vmem:[#allocation9] ss:$12 sps:$4 sm:$0xff]  }
 0x38b   :  { %2777 = vmatpush1.bf16.msra.mxu1 %v4972_v49  ;;  %v5019_v49 = vld [vmem:[#allocation9 + $0x1c] ss:$12 sps:$4 sm:$0xff]  }
 0x38c   :  { %2778 = vmatprep.subr.bf16.mxu1 %v4979_v51  ;;  %v5022_v51 = vld [vmem:[#allocation9 + $0x34] ss:$12 sps:$4 sm:$0xff]  }
 0x38f   :  { %2779 = vmatpush1.bf16.msra.mxu1 %v4977_v53  ;;  %v5025_v53 = vld [vmem:[#allocation9 + $0x4c] ss:$12 sps:$4 sm:$0xff]  }
 0x390   :  { %2789 = vmatprep.subr.bf16.mxu1 %v4984_v55  ;;  %v5028_v55 = vld [vmem:[#allocation9 + $0x64] ss:$12 sps:$4 sm:$0xff]  }
 0x405   :  { %v4352_v56 = vpop.f32.mrb[20].mxu1 }
 0x406   :  { %v4353_v57 = vpop.f32.mrb[21].mxu1 }
 0x407   :  { %v4354_v58 = vadd.f32 %v4353_v57, %v4352_v56  ;;  %v4355_v59 = vpop.f32.mrb[22].mxu1  ;;  %v5026_v56 = vld [vmem:[#allocation9 + $0x60] ss:$12 sps:$4 sm:$0xff]   ;;  %v5031_v57 = vld [vmem:[#allocation9 + $0x7c] ss:$12 sps:$4 sm:$0xff]  }
 0x408   :  { %v4356_v61 = vpop.f32.mrb[23].mxu1  ;;  %v5034_v59 = vld [vmem:[#allocation9 + $0x94] ss:$12 sps:$4 sm:$0xff]  }
 0x409   :  { %v2200_v4 = vadd.f32 %v4354_v58, %v1695_v1  ;;  %v5029_v58 = vld [vmem:[#allocation9 + $0x78] ss:$12 sps:$4 sm:$0xff]   ;;  %v5032_v61 = vld [vmem:[#allocation9 + $0x90] ss:$12 sps:$4 sm:$0xff]   ;;  %v5035_v1 = vld [vmem:[#allocation9 + $0xa8] ss:$12 sps:$4 sm:$0xff]  }
 0x425   :  { %v2158_v5 = vpop.f32.mrb[12].mxu0  ;;  %v2239_v6 = vpop.f32.mrb[24].mxu1 }
 0x426   :  { %v4590_v7 = vadd.f32 %v2158_v5, %v1687_v2  ;;  %v5526_v8 = vadd.f32 %v2239_v6, %v2200_v4  ;;  %v2160_v9 = vpop.f32.mrb[13].mxu0  ;;  %v4524_v11 = vpop.f32.mrb[25].mxu1  ;;  %v5040_v2 = vld [vmem:[#allocation9 + $0xc4] ss:$12 sps:$4 sm:$0xff]   ;;  %v5042_v4 = vld [vmem:[#allocation9 + $0x8] ss:$12 sps:$4 sm:$0xff]  }
 0x427   :  { %v4591_v12 = vadd.f32 %v2160_v9, %v1691_v3  ;;  %v2162_v13 = vpop.f32.mrb[14].mxu0  ;;  %v2242_v14 = vpop.f32.mrb[26].mxu1  ;;  %v5041_v3 = vld [vmem:[#allocation9 + $0xc8] ss:$12 sps:$4 sm:$0xff]   ;;  %v5038_v5 = vld [vmem:[#allocation9 + $0xc0] ss:$12 sps:$4 sm:$0xff]  }
 0x428   :  { %v2245_v15 = vmax.f32 %v4590_v7, 0.0  ;;  %v2163_v16 = vpop.f32.mrb[15].mxu0  ;;  %v4525_v17 = vpop.f32.mrb[27].mxu1  ;;  %v2247_v45 = vmax.f32 %v5526_v8, 0.0  ;;  %v5046_v6 = vld [vmem:[#allocation9 + $0xe0] ss:$12 sps:$4 sm:$0xff]  }
 0x429   :  { %v2246_v18 = vmax.f32 %v4591_v12, 0.0  ;;  %v5045_v7 = vld [vmem:[#allocation9 + $0xdc] ss:$12 sps:$4 sm:$0xff]   ;;  %v5047_v8 = vld [vmem:[#allocation9 + $0x20] ss:$12 sps:$4 sm:$0xff]  }
 0x42a   :  { %v2248_v22 = vpack.c.bf16 %v2245_v15, %v2245_v15  ;;  %v2250_v48 = vpack.c.bf16 %v2247_v45, %v2247_v45  ;;  %v5051_v9 = vld [vmem:[#allocation9 + $0xf8] ss:$12 sps:$4 sm:$0xff]   ;;  %v5050_v12 = vld [vmem:[#allocation9 + $0xf4] ss:$12 sps:$4 sm:$0xff]   ;;  %v5056_v14 = vld [vmem:[#allocation9 + $0x110] ss:$12 sps:$4 sm:$0xff]  }
 0x42b   :  { %v2249_v19 = vpack.c.bf16 %v2246_v18, %v2246_v18  ;;  %v5043_v11 = vld [vmem:[#allocation9 + $0xd8] ss:$12 sps:$4 sm:$0xff]   ;;  %v5048_v15 = vld [vmem:[#allocation9 + $0xf0] ss:$12 sps:$4 sm:$0xff]   ;;  %v5061_v18 = vld [vmem:[#allocation9 + $0x128] ss:$12 sps:$4 sm:$0xff]  }
 0x42c   :  { %v5052_v13 = vld [vmem:[#allocation9 + $0x38] ss:$12 sps:$4 sm:$0xff]   ;;  %v5057_v17 = vld [vmem:[#allocation9 + $0x50] ss:$12 sps:$4 sm:$0xff]  }
 0x42d   :  { %2780 = vmatprep.mubr.bf16.mxu1 %v2249_v19  ;;  %2862 = vmatprep.mubr.bf16.mxu0 %v2249_v19  ;;  %v5055_v16 = vld [vmem:[#allocation9 + $0x10c] ss:$12 sps:$4 sm:$0xff]   ;;  %v5053_v19 = vld [vmem:[#allocation9 + $0x108] ss:$12 sps:$4 sm:$0xff]  }
 0x42e   :  { %2781 = vmatmul.mubr.bf16.vlgmr.msra.gmra.mrb[28].mxu1 %v2248_v22  ;;  %2863 = vmatmul.mubr.bf16.vlgmr.msra.gmra.mrb[16].mxu0 %v2248_v22  ;;  %v5066_v22 = vld [vmem:[#allocation9 + $0x140] ss:$12 sps:$4 sm:$0xff]  }
 0x42f   :  { %2790 = vmatpush1.bf16.msra.mxu1 %v4982_v20  ;;  %4527 = vmatpush3.bf16.msra.mxu0 %v4985_v21  ;;  %v5060_v20 = vld [vmem:[#allocation9 + $0x124] ss:$12 sps:$4 sm:$0xff]   ;;  %v5062_v21 = vld [vmem:[#allocation9 + $0x68] ss:$12 sps:$4 sm:$0xff]  }
 0x430   :  { %2791 = vmatprep.subr.bf16.mxu1 %v4988_v23  ;;  %4528 = vmatprep.subr.bf16.mxu0 %v5262_v10  ;;  %v5058_v23 = vld [vmem:[#allocation9 + $0x120] ss:$12 sps:$4 sm:$0xff]  }
 0x431   :  { %2821 = vmatprep.mubr.bf16.mxu1 %v5261_v0  ;;  %4542 = vmatprep.mubr.msk.bf16.mxu0 %vm5263_vm2, %v5262_v10 }
 0x433   :  { %2792 = vmatpush1.bf16.msra.mxu1 %v4986_v24  ;;  %4529 = vmatpush3.bf16.msra.mxu0 %v4989_v25  ;;  %v5065_v24 = vld [vmem:[#allocation9 + $0x13c] ss:$12 sps:$4 sm:$0xff]   ;;  %v5067_v25 = vld [vmem:[#allocation9 + $0x80] ss:$12 sps:$4 sm:$0xff]  }
 0x434   :  { %2793 = vmatprep.subr.bf16.mxu1 %v4992_v26  ;;  %4530 = vmatprep.subr.bf16.mxu0 %v5262_v10  ;;  %v5063_v26 = vld [vmem:[#allocation9 + $0x138] ss:$12 sps:$4 sm:$0xff]  }
 0x437   :  { %2794 = vmatpush1.bf16.msra.mxu1 %v4990_v27  ;;  %4531 = vmatpush3.bf16.msra.mxu0 %v4993_v28  ;;  %v5070_v27 = vld [vmem:[#allocation9 + $0x154] ss:$12 sps:$4 sm:$0xff]   ;;  %v5071_v28 = vld [vmem:[#allocation9 + $0x158] ss:$12 sps:$4 sm:$0xff]  }
 0x438   :  { %2795 = vmatprep.subr.bf16.mxu1 %v4996_v30  ;;  %4532 = vmatprep.subr.bf16.mxu0 %v5262_v10  ;;  %v5068_v30 = vld [vmem:[#allocation9 + $0x150] ss:$12 sps:$4 sm:$0xff]  }
 0x43b   :  { %2796 = vmatpush1.bf16.msra.mxu1 %v4994_v31  ;;  %4533 = vmatpush3.bf16.msra.mxu0 %v4997_v32  ;;  %v5072_v31 = vld [vmem:[#allocation9 + $0x98] ss:$12 sps:$4 sm:$0xff]  }
 0x43c   :  { %2797 = vmatprep.subr.bf16.mxu1 %v5000_v33  ;;  %4534 = vmatprep.subr.bf16.mxu0 %v5262_v10  ;;  %v5075_v32 = vld [vmem:[#allocation9 + $0x16c] ss:$12 sps:$4 sm:$0xff]   ;;  %v5076_v33 = vld [vmem:[#allocation9 + $0x170] ss:$12 sps:$4 sm:$0xff]  }
 0x43f   :  { %2798 = vmatpush1.bf16.msra.mxu1 %v4998_v34  ;;  %4535 = vmatpush3.bf16.msra.mxu0 %v5001_v35  ;;  %v5073_v34 = vld [vmem:[#allocation9 + $0x168] ss:$12 sps:$4 sm:$0xff]   ;;  %v5077_v35 = vld [vmem:[#allocation9 + $0xb0] ss:$12 sps:$4 sm:$0xff]  }
 0x440   :  { %2799 = vmatprep.subr.bf16.mxu1 %v5004_v36  ;;  %4536 = vmatprep.subr.bf16.mxu0 %v5262_v10  ;;  %v5080_v36 = vld [vmem:[#allocation9 + $0x184] ss:$12 sps:$4 sm:$0xff]  }
 0x443   :  { %2800 = vmatpush1.bf16.msra.mxu1 %v5002_v37  ;;  %4537 = vmatpush3.bf16.msra.mxu0 %v5005_v38 }
 0x444   :  { %2801 = vmatprep.subr.bf16.mxu1 %v5008_v39  ;;  %4538 = vmatprep.subr.bf16.mxu0 %v5262_v10 }
 0x447   :  { %2802 = vmatpush1.bf16.msra.mxu1 %v5006_v40  ;;  %4539 = vmatpush3.bf16.msra.mxu0 %v5009_v41 }
 0x448   :  { %2803 = vmatprep.subr.bf16.mxu1 %v5012_v42  ;;  %4540 = vmatprep.subr.bf16.mxu0 %v5262_v10  ;;  %v2347_v42 = vld [vmem:[%s5666_s10] sm:$0x7] }
 0x449   :  { %v2356_v45 = vrot.slane %v2347_v42, %v5459_v62 }
 0x44b   :  { %2804 = vmatpush1.bf16.msra.mxu1 %v5010_v43  ;;  %4541 = vmatpush3.bf16.msra.mxu0 %v5013_v44  ;;  %v2360_v43 = vrot.slane %v2347_v42, %v5471_v29  ;;  %v2352_v44 = vrot.slane %v2347_v42, %v5452_v60  ;;  %v5126_v42 = vld [vmem:[%s5669_s13 + $0x68] sm:$0xff]  }
 0x44c   :  { %3413 = vmatprep.subr.bf16.mxu0 %v5016_v46  ;;  %4398 = vmatprep.subr.bf16.mxu1 %v5041_v3  ;;  %v5084_v3 = vld [vmem:[#allocation9 + $0x19c] ss:$12 sps:$4 sm:$0xff]  }
 0x44e   :  { %2822 = vmatmul.mubr.bf16.vlgmr.msra.gmra.mrb[28].mxu1 %v2250_v48  ;;  %4543 = vmatmul.mubr.bf16.vlgmr.msra.gmra.mrb[20].mxu0 %v2250_v48 }
 0x44f   :  { %3414 = vmatpush1.bf16.msra.mxu0 %v5014_v47  ;;  %4399 = vmatpush3.bf16.msra.mxu1 %v5042_v4  ;;  %v5082_v4 = vld [vmem:[#allocation9 + $0x198] ss:$12 sps:$4 sm:$0xff]  }
 0x450   :  { %3415 = vmatprep.subr.bf16.mxu0 %v5019_v49  ;;  %4400 = vmatprep.subr.bf16.mxu1 %v5046_v6  ;;  %v5088_v6 = vld [vmem:[#allocation9 + $0x1b4] ss:$12 sps:$4 sm:$0xff]  }
 0x453   :  { %3416 = vmatpush1.bf16.msra.mxu0 %v5017_v50  ;;  %4401 = vmatpush3.bf16.msra.mxu1 %v5047_v8  ;;  %v5089_v8 = vld [vmem:[#allocation9 + $0x1b8] ss:$12 sps:$4 sm:$0xff]  }
 0x454   :  { %3417 = vmatprep.subr.bf16.mxu0 %v5022_v51  ;;  %4402 = vmatprep.subr.bf16.mxu1 %v5051_v9  ;;  %v5092_v9 = vld [vmem:[#allocation9 + $0x1cc] ss:$12 sps:$4 sm:$0xff]  }
 0x457   :  { %3418 = vmatpush1.bf16.msra.mxu0 %v5020_v52  ;;  %4403 = vmatpush3.bf16.msra.mxu1 %v5052_v13  ;;  %v5096_v13 = vld [vmem:[#allocation9 + $0x1e4] ss:$12 sps:$4 sm:$0xff]  }
 0x458   :  { %3419 = vmatprep.subr.bf16.mxu0 %v5025_v53  ;;  %4404 = vmatprep.subr.bf16.mxu1 %v5056_v14  ;;  %v5097_v14 = vld [vmem:[#allocation9 + $0x1e8] ss:$12 sps:$4 sm:$0xff]  }
 0x45b   :  { %3420 = vmatpush1.bf16.msra.mxu0 %v5023_v54  ;;  %4405 = vmatpush3.bf16.msra.mxu1 %v5057_v17  ;;  %v5101_v17 = vld [vmem:[#allocation9 + $0x200] ss:$12 sps:$4 sm:$0xff]  }
 0x45c   :  { %3421 = vmatprep.subr.bf16.mxu0 %v5028_v55  ;;  %4406 = vmatprep.subr.bf16.mxu1 %v5061_v18  ;;  %v5104_v18 = vld [vmem:[#allocation9 + $0x214] ss:$12 sps:$4 sm:$0xff]  }
 0x45f   :  { %3422 = vmatpush1.bf16.msra.mxu0 %v5026_v56  ;;  %4407 = vmatpush3.bf16.msra.mxu1 %v5062_v21  ;;  %v5108_v21 = vld [vmem:[#allocation9 + $0x22c] ss:$12 sps:$4 sm:$0xff]  }
 0x460   :  { %3423 = vmatprep.subr.bf16.mxu0 %v5031_v57  ;;  %4408 = vmatprep.subr.bf16.mxu1 %v5066_v22  ;;  %v5106_v22 = vld [vmem:[#allocation9 + $0x228] ss:$12 sps:$4 sm:$0xff]  }
 0x463   :  { %3424 = vmatpush1.bf16.msra.mxu0 %v5029_v58  ;;  %4409 = vmatpush3.bf16.msra.mxu1 %v5067_v25 }
 0x464   :  { %3425 = vmatprep.subr.bf16.mxu0 %v5034_v59  ;;  %4410 = vmatprep.subr.bf16.mxu1 %v5071_v28  ;;  %v5112_v28 = vld [vmem:[%s5669_s13] sm:$0xff]  }
 0x467   :  { %3426 = vmatpush1.bf16.msra.mxu0 %v5032_v61  ;;  %4411 = vmatpush3.bf16.msra.mxu1 %v5072_v31  ;;  %v5113_v31 = vld [vmem:[%s5669_s13 + $0x88] sm:$0xff]  }
 0x468   :  { %3427 = vmatprep.subr.bf16.mxu0 %v5037_v63  ;;  %4412 = vmatprep.subr.bf16.mxu1 %v5076_v33  ;;  %v5078_v63 = vld [vmem:[#allocation9 + $0x180] ss:$12 sps:$4 sm:$0xff]   ;;  %v5117_v33 = vld [vmem:[%s5669_s13 + $0x50] sm:$0xff]  }
 0x46b   :  { %3428 = vmatpush1.bf16.msra.mxu0 %v5035_v1  ;;  %4413 = vmatpush3.bf16.msra.mxu1 %v5077_v35  ;;  %v5081_v1 = vld [vmem:[#allocation9 + $0x188] ss:$12 sps:$4 sm:$0xff]  }
 0x46c   :  { %3429 = vmatprep.subr.bf16.mxu0 %v5040_v2  ;;  %4546 = vmatprep.subr.bf16.mxu1 %v5262_v10  ;;  %v5118_v35 = vld [vmem:[%s5669_s13 + $0x10] sm:$0xff]  }
 0x46f   :  { %3430 = vmatpush1.bf16.msra.mxu0 %v5038_v5  ;;  %v5085_v5 = vld [vmem:[#allocation9 + $0x1a0] ss:$12 sps:$4 sm:$0xff]  }
 0x470   :  { %3431 = vmatprep.subr.bf16.mxu0 %v5045_v7  ;;  %v5086_v7 = vld [vmem:[#allocation9 + $0x1b0] ss:$12 sps:$4 sm:$0xff]  }
 0x473   :  { %3432 = vmatpush1.bf16.msra.mxu0 %v5043_v11  ;;  %v5090_v11 = vld [vmem:[#allocation9 + $0x1c8] ss:$12 sps:$4 sm:$0xff]  }
 0x474   :  { %3433 = vmatprep.subr.bf16.mxu0 %v5050_v12  ;;  %v5093_v12 = vld [vmem:[#allocation9 + $0x1d0] ss:$12 sps:$4 sm:$0xff]  }
 0x477   :  { %3434 = vmatpush1.bf16.msra.mxu0 %v5048_v15  ;;  %v5100_v15 = vld [vmem:[#allocation9 + $0x1fc] ss:$12 sps:$4 sm:$0xff]  }
 0x478   :  { %3435 = vmatprep.subr.bf16.mxu0 %v5055_v16  ;;  %v5098_v16 = vld [vmem:[#allocation9 + $0x1f8] ss:$12 sps:$4 sm:$0xff]  }
 0x47b   :  { %3436 = vmatpush1.bf16.msra.mxu0 %v5053_v19  ;;  %v5102_v19 = vld [vmem:[#allocation9 + $0x210] ss:$12 sps:$4 sm:$0xff]  }
 0x47c   :  { %3437 = vmatprep.subr.bf16.mxu0 %v5060_v20  ;;  %v5105_v20 = vld [vmem:[#allocation9 + $0x218] ss:$12 sps:$4 sm:$0xff]  }
 0x47f   :  { %3438 = vmatpush1.bf16.msra.mxu0 %v5058_v23  ;;  %v5109_v23 = vld [vmem:[#allocation9 + $0x230] ss:$12 sps:$4 sm:$0xff]  }
 0x480   :  { %3439 = vmatprep.subr.bf16.mxu0 %v5065_v24 }
 0x483   :  { %3440 = vmatpush1.bf16.msra.mxu0 %v5063_v26  ;;  %v5110_v26 = vld [vmem:[%s5669_s13 + $0x80] sm:$0xff]  }
 0x484   :  { %3441 = vmatprep.subr.bf16.mxu0 %v5070_v27  ;;  %v5111_v27 = vld [vmem:[%s5669_s13 + $0x40] sm:$0xff]  }
 0x487   :  { %3442 = vmatpush1.bf16.msra.mxu0 %v5068_v30  ;;  %v5114_v30 = vld [vmem:[%s5669_s13 + $0x48] sm:$0xff]  }
 0x488   :  { %3443 = vmatprep.subr.bf16.mxu0 %v5075_v32  ;;  %v5115_v32 = vld [vmem:[%s5669_s13 + $0x8] sm:$0xff]  }
 0x48b   :  { %3444 = vmatpush1.bf16.msra.mxu0 %v5073_v34  ;;  %v5116_v34 = vld [vmem:[%s5669_s13 + $0x90] sm:$0xff]  }
 0x48c   :  { %3454 = vmatprep.subr.bf16.mxu0 %v5080_v36  ;;  %v5120_v36 = vld [vmem:[%s5669_s13 + $0x58] sm:$0xff]  }
 0x501   :  { %v4383_v37 = vpop.f32.mrb[16].mxu0 }
 0x502   :  { %v4384_v38 = vpop.f32.mrb[17].mxu0 }
 0x503   :  { %v4385_v39 = vadd.f32 %v4384_v38, %v4383_v37  ;;  %v4386_v40 = vpop.f32.mrb[18].mxu0  ;;  %v5119_v37 = vld [vmem:[%s5669_s13 + $0x98] sm:$0xff]  }
 0x504   :  { %v4387_v41 = vpop.f32.mrb[19].mxu0  ;;  %v5121_v38 = vld [vmem:[%s5669_s13 + $0x18] sm:$0xff]   ;;  %v5122_v40 = vld [vmem:[%s5669_s13 + $0xa0] sm:$0xff]  }
 0x505   :  { %v2865_v46 = vadd.f32 %v4385_v39, %v2360_v43  ;;  %v5123_v39 = vld [vmem:[%s5669_s13 + $0x60] sm:$0xff]   ;;  %v5125_v43 = vld [vmem:[%s5669_s13 + $0xa8] sm:$0xff]  }
 0x506   :  { %v5124_v41 = vld [vmem:[%s5669_s13 + $0x20] sm:$0xff]  }
 0x521   :  { %v2823_v47 = vpop.f32.mrb[28].mxu1  ;;  %v2904_v48 = vpop.f32.mrb[20].mxu0 }
 0x522   :  { %v4592_v49 = vadd.f32 %v2823_v47, %v2352_v44  ;;  %v5546_v50 = vadd.f32 %v2904_v48, %v2865_v46  ;;  %v2825_v51 = vpop.f32.mrb[29].mxu1  ;;  %v4544_v52 = vpop.f32.mrb[21].mxu0  ;;  %v5127_v44 = vld [vmem:[%s5669_s13 + $0x28] sm:$0xff]   ;;  %v5129_v46 = vld [vmem:[%s5669_s13 + $0x70] sm:$0xff]   ;;  %v5131_v48 = vld [vmem:[%s5669_s13 + $0xb8] sm:$0xff]  }
 0x523   :  { %v4593_v53 = vadd.f32 %v2825_v51, %v2356_v45  ;;  %v2827_v54 = vpop.f32.mrb[30].mxu1  ;;  %v2907_v55 = vpop.f32.mrb[22].mxu0  ;;  %v5128_v45 = vld [vmem:[%s5669_s13 + $0xb0] sm:$0xff]  }
 0x524   :  { %v2910_v56 = vmax.f32 %v4592_v49, 0.0  ;;  %v2828_v57 = vpop.f32.mrb[31].mxu1  ;;  %v4545_v58 = vpop.f32.mrb[23].mxu0  ;;  %v2912_v24 = vmax.f32 %v5546_v50, 0.0  ;;  %v5130_v47 = vld [vmem:[%s5669_s13 + $0x30] sm:$0xff]   ;;  %v5132_v49 = vld [vmem:[%s5669_s13 + $0x78] sm:$0xff]  }
 0x525   :  { %v2911_v59 = vmax.f32 %v4593_v53, 0.0  ;;  %v5133_v50 = vld [vmem:[%s5669_s13 + $0x38] sm:$0xff]   ;;  %v3012_v55 = vld [vmem:[%s5668_s12] sm:$0x7] }
 0x526   :  { %v2913_v2 = vpack.c.bf16 %v2910_v56, %v2910_v56  ;;  %v2915_v25 = vpack.c.bf16 %v2912_v24, %v2912_v24  ;;  %v3025_v56 = vrot.slane %v3012_v55, %v5471_v29  ;;  %v3017_v57 = vrot.slane %v3012_v55, %v5452_v60 }
 0x527   :  { %v2914_v61 = vpack.c.bf16 %v2911_v59, %v2911_v59  ;;  %v3021_v58 = vrot.slane %v3012_v55, %v5459_v62 }
 0x529   :  { %3445 = vmatprep.mubr.bf16.mxu0 %v2914_v61  ;;  %3527 = vmatprep.mubr.bf16.mxu1 %v2914_v61 }
 0x52a   :  { %3446 = vmatmul.mubr.bf16.vlgmr.msra.gmra.mrb[24].mxu0 %v2913_v2  ;;  %3528 = vmatmul.mubr.bf16.vlgmr.msra.gmra.mrb[32].mxu1 %v2913_v2 }
 0x52b   :  { %3455 = vmatpush1.bf16.msra.mxu0 %v5078_v63  ;;  %4547 = vmatpush3.bf16.msra.mxu1 %v5081_v1 }
 0x52c   :  { %3456 = vmatprep.subr.bf16.mxu0 %v5084_v3  ;;  %4548 = vmatprep.subr.bf16.mxu1 %v5262_v10 }
 0x52d   :  { %3486 = vmatprep.mubr.bf16.mxu0 %v5261_v0  ;;  %4562 = vmatprep.mubr.msk.bf16.mxu1 %vm5263_vm2, %v5262_v10  ;;  %v5094_v0 = vld [vmem:[#allocation9 + $0x1e0] ss:$12 sps:$4 sm:$0xff]  }
 0x52f   :  { %3457 = vmatpush1.bf16.msra.mxu0 %v5082_v4  ;;  %4549 = vmatpush3.bf16.msra.mxu1 %v5085_v5 }
 0x530   :  { %3458 = vmatprep.subr.bf16.mxu0 %v5088_v6  ;;  %4550 = vmatprep.subr.bf16.mxu1 %v5262_v10 }
 0x533   :  { %3459 = vmatpush1.bf16.msra.mxu0 %v5086_v7  ;;  %4551 = vmatpush3.bf16.msra.mxu1 %v5089_v8 }
 0x534   :  { %3460 = vmatprep.subr.bf16.mxu0 %v5092_v9  ;;  %4552 = vmatprep.subr.bf16.mxu1 %v5262_v10 }
 0x537   :  { %3461 = vmatpush1.bf16.msra.mxu0 %v5090_v11  ;;  %4553 = vmatpush3.bf16.msra.mxu1 %v5093_v12 }
 0x538   :  { %3462 = vmatprep.subr.bf16.mxu0 %v5096_v13  ;;  %4554 = vmatprep.subr.bf16.mxu1 %v5262_v10 }
 0x53b   :  { %3463 = vmatpush1.bf16.msra.mxu0 %v5094_v0  ;;  %4555 = vmatpush3.bf16.msra.mxu1 %v5097_v14 }
 0x53c   :  { %3464 = vmatprep.subr.bf16.mxu0 %v5100_v15  ;;  %4556 = vmatprep.subr.bf16.mxu1 %v5262_v10 }
 0x53f   :  { %3465 = vmatpush1.bf16.msra.mxu0 %v5098_v16  ;;  %4557 = vmatpush3.bf16.msra.mxu1 %v5101_v17  ;;  %v4247_v17 = vld [vmem:[%s5670_s14] ss:$0 sm:$0xff] }
 0x540   :  { %3466 = vmatprep.subr.bf16.mxu0 %v5104_v18  ;;  %4558 = vmatprep.subr.bf16.mxu1 %v5262_v10 }
 0x543   :  { %3467 = vmatpush1.bf16.msra.mxu0 %v5102_v19  ;;  %4559 = vmatpush3.bf16.msra.mxu1 %v5105_v20 }
 0x544   :  { %3468 = vmatprep.subr.bf16.mxu0 %v5108_v21  ;;  %4560 = vmatprep.subr.bf16.mxu1 %v5262_v10 }
 0x547   :  { %3469 = vmatpush1.bf16.msra.mxu0 %v5106_v22  ;;  %4561 = vmatpush3.bf16.msra.mxu1 %v5109_v23 }
 0x548   :  { %4566 = vmatprep.subr.bf16.mxu0 %v5262_v10  ;;  %4429 = vmatprep.subr.bf16.mxu1 %v5111_v27 }
 0x54a   :  { %3487 = vmatmul.mubr.bf16.vlgmr.msra.gmra.mrb[24].mxu0 %v2915_v25  ;;  %4563 = vmatmul.mubr.bf16.vlgmr.msra.gmra.mrb[36].mxu1 %v2915_v25 }
 0x54b   :  { %4582 = vmatprep.mubr.msk.bf16.mxu0 %vm5263_vm2, %v5262_v10  ;;  %4567 = vmatpush3.bf16.msra.mxu0 %v5110_v26 }
 0x54c   :  { %4430 = vmatpush3.bf16.msra.mxu1 %v5112_v28  ;;  %4568 = vmatprep.subr.bf16.mxu0 %v5262_v10 }
 0x54d   :  { %4431 = vmatprep.subr.bf16.mxu1 %v5114_v30 }
 0x54f   :  { %4569 = vmatpush3.bf16.msra.mxu0 %v5113_v31 }
 0x550   :  { %4432 = vmatpush3.bf16.msra.mxu1 %v5115_v32  ;;  %4570 = vmatprep.subr.bf16.mxu0 %v5262_v10 }
 0x551   :  { %4433 = vmatprep.subr.bf16.mxu1 %v5117_v33 }
 0x553   :  { %4571 = vmatpush3.bf16.msra.mxu0 %v5116_v34 }
 0x554   :  { %4434 = vmatpush3.bf16.msra.mxu1 %v5118_v35  ;;  %4572 = vmatprep.subr.bf16.mxu0 %v5262_v10 }
 0x555   :  { %4435 = vmatprep.subr.bf16.mxu1 %v5120_v36 }
 0x557   :  { %4573 = vmatpush3.bf16.msra.mxu0 %v5119_v37 }
 0x558   :  { %4436 = vmatpush3.bf16.msra.mxu1 %v5121_v38  ;;  %4574 = vmatprep.subr.bf16.mxu0 %v5262_v10 }
 0x559   :  { %4437 = vmatprep.subr.bf16.mxu1 %v5123_v39 }
 0x55b   :  { %4575 = vmatpush3.bf16.msra.mxu0 %v5122_v40 }
 0x55c   :  { %4438 = vmatpush3.bf16.msra.mxu1 %v5124_v41  ;;  %4576 = vmatprep.subr.bf16.mxu0 %v5262_v10 }
 0x55d   :  { %4439 = vmatprep.subr.bf16.mxu1 %v5126_v42 }
 0x55f   :  { %4577 = vmatpush3.bf16.msra.mxu0 %v5125_v43 }
 0x560   :  { %4440 = vmatpush3.bf16.msra.mxu1 %v5127_v44  ;;  %4578 = vmatprep.subr.bf16.mxu0 %v5262_v10 }
 0x561   :  { %4441 = vmatprep.subr.bf16.mxu1 %v5129_v46 }
 0x563   :  { %4579 = vmatpush3.bf16.msra.mxu0 %v5128_v45 }
 0x564   :  { %4580 = vmatprep.subr.bf16.mxu0 %v5262_v10  ;;  %4442 = vmatpush3.bf16.msra.mxu1 %v5130_v47 }
 0x565   :  { %4443 = vmatprep.subr.bf16.mxu1 %v5132_v49 }
 0x567   :  { %4581 = vmatpush3.bf16.msra.mxu0 %v5131_v48 }
 0x568   :  { %4444 = vmatpush3.bf16.msra.mxu1 %v5133_v50 }
 0x5fd   :  { %v4414_v51 = vpop.f32.mrb[32].mxu1 }
 0x5fe   :  { %v4415_v52 = vpop.f32.mrb[33].mxu1 }
 0x5ff   :  { %v4416_v53 = vadd.f32 %v4415_v52, %v4414_v51  ;;  %v4417_v10 = vpop.f32.mrb[34].mxu1 }
 0x600   :  { %v4418_v54 = vpop.f32.mrb[35].mxu1 }
 0x601   :  { %v3530_v59 = vadd.f32 %v4416_v53, %v3025_v56 }
 0x61d   :  { %v3488_v61 = vpop.f32.mrb[24].mxu0  ;;  %v3569_v63 = vpop.f32.mrb[36].mxu1 }
 0x61e   :  { %v4594_v1 = vadd.f32 %v3488_v61, %v3017_v57  ;;  %v3570_v2 = vadd.f32 %v3569_v63, %v3530_v59  ;;  %v3490_v3 = vpop.f32.mrb[25].mxu0  ;;  %v4564_v4 = vpop.f32.mrb[37].mxu1 }
 0x61f   :  { %v4595_v5 = vadd.f32 %v3490_v3, %v3021_v58  ;;  %v3492_v6 = vpop.f32.mrb[26].mxu0  ;;  %v3572_v7 = vpop.f32.mrb[38].mxu1 }
 0x620   :  { %v3575_v8 = vmax.f32 %v4594_v1, 0.0  ;;  %v3577_v9 = vmax.f32 %v3570_v2, 0.0  ;;  %v3493_v11 = vpop.f32.mrb[27].mxu0  ;;  %v4565_v12 = vpop.f32.mrb[39].mxu1 }
 0x621   :  { %v3576_v13 = vmax.f32 %v4595_v5, 0.0 }
 0x622   :  { %v3580_v29 = vpack.c.bf16 %v3577_v9, %v3577_v9  ;;  %v3578_v60 = vpack.c.bf16 %v3575_v8, %v3575_v8 }
 0x623   :  { %v3579_v0 = vpack.c.bf16 %v3576_v13, %v3576_v13 }
 0x624   :  { %4583 = vmatmul.mubr.bf16.vlgmr.msra.gmra.mrb[28].mxu0 %v3580_v29 }
 0x625   :  { %3812 = vmatprep.mubr.bf16.mxu1 %v3579_v0 }
 0x626   :  { %3813 = vmatmul.mubr.bf16.vlgmr.msra.gmra.mrb[40].mxu1 %v3578_v60 }
 0x6f7   :  { %v3854_v62 = vpop.f32.mrb[28].mxu0 }
 0x6f8   :  { %v4584_v14 = vpop.f32.mrb[29].mxu0 }
 0x6f9   :  { %v4445_v15 = vpop.f32.mrb[40].mxu1  ;;  %v3857_v16 = vpop.f32.mrb[30].mxu0 }
 0x6fa   :  { %v4446_v18 = vpop.f32.mrb[41].mxu1  ;;  %v4585_v19 = vpop.f32.mrb[31].mxu0 }
 0x6fb   :  { %v4447_v20 = vadd.f32 %v4446_v18, %v4445_v15  ;;  %v4448_v21 = vpop.f32.mrb[42].mxu1 }
 0x6fc   :  { %v4449_v22 = vpop.f32.mrb[43].mxu1 }
 0x6fd   :  { %v3815_v23 = vadd.f32 %v4447_v20, %v4247_v17 }
 0x6ff   :  { %v3855_v24 = vadd.f32 %v3854_v62, %v3815_v23 }
 0x701   :  { %v3861_v25 = vsel %vm3860_vm3, %v3855_v24, -inf }
 0x702   :  { %3862 = vmax.xlane.f32.xlu0 %v3861_v25 }
 0x78f   :  { %v3863_v26 = vpop.xlane.xlu0 %3862 }
 0x790   :  { %v3864_v27 = vsub.f32 %v3855_v24, %v3863_v26 }
 0x792   :  { %v3865_v28 = vmul.f32 1.442695, %v3864_v27 }
 0x794   :  { %5134 = vpow2.f32 %v3865_v28 }
 0x79e   :  { %v5135_v30 = vpop.eup %5134 }
 0x79f   :  { %v3867_v31 = vsel %vm3860_vm3, %v5135_v30, 0.0 }
 0x7a0   :  { %3868 = vadd.xlane.f32.xlu0 %v3867_v31 }
 0x82d   :  { %v3869_v32 = vpop.xlane.xlu0 %3868 }
 0x82e   :  { %5136 = vlog2.f32 %v3869_v32 }
 0x838   :  { %v5137_v33 = vpop.eup %5136 }
 0x839   :  { %v3871_v34 = vmul.f32 0.6931472, %v5137_v33 }
 0x83b   :  { %v3872_v35 = vsub.f32 %v3864_v27, %v3871_v34 }
 0x83d   :  { %3873 = vst.msk [vmem:[%s5671_s15] sm:$0xff] %vm3860_vm3, %v3872_v35 }
 0x83e   :  { %3878 = vsyncpa [#allocation3], 1 }
 0x83f   :  { %3879 = vsyncpa [#allocation5], 1 }
 0x840   :  { %3880 = vsyncpa [#allocation8], 1 }

</bundles_post_ra>
